<compile_context>
chip_gen: v7x
topology: tpu7x:2x2x1
jax: 0.10.0
libtpu: 0.0.40
codegen_flags: <defaults>
</compile_context>

<pallas_src>
import jax
import jax.numpy as jnp
from jax.experimental import pallas as pl
from jax.experimental.pallas import tpu as pltpu

I = 26   # input size
H = 17   # hidden size
L = 2    # num layers
B = 3    # batch (fixed by h0 = torch.zeros(2, 3, 17) in the PyTorch module)


def gru_kernel(x_ref, wx0_ref, bx0_ref, wh0_ref, bhn0_ref,
               wx1_ref, bx1_ref, wh1_ref, bhn1_ref,
               out_ref, hn_ref):
    """Whole sequence in one kernel invocation.

    x_ref   : (T*B, I)  f32   time-major flattened input
    wx*_ref : (in, 3H)  bf16  input-path weights   [r | z | n]
    bx*_ref : (1, 3H)   f32   input-path biases    [b_ir+b_hr | b_iz+b_hz | b_in]
    wh*_ref : (H, 3H)   bf16  hidden-path weights  [r | z | n]
    bhn*_ref: (1, H)    f32   hidden n-gate bias (kept separate: r*(W_hn h + b_hn))
    out_ref : (T, B, H) f32   time-major top-layer output
    hn_ref  : (L, B, H) f32   final hidden state per layer
    """
    T, Bx, _ = out_ref.shape

    # Hoisted weight loads and bias broadcasts — read/built once, reused
    # across both fully-unrolled time loops.
    wx0 = wx0_ref[...]
    wh0 = wh0_ref[...]
    wx1 = wx1_ref[...]
    wh1 = wh1_ref[...]
    bx0 = jnp.broadcast_to(bx0_ref[...], (T * Bx, 3 * H))
    bx1 = jnp.broadcast_to(bx1_ref[...], (T * Bx, 3 * H))
    bhn0 = jnp.broadcast_to(bhn0_ref[...], (Bx, H))
    bhn1 = jnp.broadcast_to(bhn1_ref[...], (Bx, H))

    def recur(gi_t, h_prev, wh, bhn):
        # One small MXU push per step (bf16 operands, f32 accumulate);
        # gates in f32 on VPU/EUP.
        gh = jnp.dot(h_prev.astype(jnp.bfloat16), wh,
                     preferred_element_type=jnp.float32)              # (B, 3H)
        r = jax.nn.sigmoid(gi_t[:, 0:H] + gh[:, 0:H])
        z = jax.nn.sigmoid(gi_t[:, H:2 * H] + gh[:, H:2 * H])
        n = jnp.tanh(gi_t[:, 2 * H:] + r * (gh[:, 2 * H:] + bhn))
        return (1.0 - z) * n + z * h_prev

    # ---- Layer 0: input GEMM hoisted off the recurrence --------------------
    gi0 = jnp.dot(x_ref[...].astype(jnp.bfloat16), wx0,
                  preferred_element_type=jnp.float32) + bx0           # (T*B, 3H)

    h0 = jnp.zeros((Bx, H), jnp.float32)
    h0_seq = []
    for t in range(T):                            # unrolled; static slices
        h0 = recur(gi0[t * Bx:(t + 1) * Bx, :], h0, wh0, bhn0)
        h0_seq.append(h0)

    # ---- Layer 1: its input GEMM is one batched dot over the h0 sequence ---
    h0_all = jnp.concatenate(h0_seq, axis=0)                          # (T*B, H)
    gi1 = jnp.dot(h0_all.astype(jnp.bfloat16), wx1,
                  preferred_element_type=jnp.float32) + bx1           # (T*B, 3H)

    h1 = jnp.zeros((Bx, H), jnp.float32)
    for t in range(T):
        h1 = recur(gi1[t * Bx:(t + 1) * Bx, :], h1, wh1, bhn1)
        out_ref[t] = h1            # time-major: one contiguous store per step

    # Final hidden states, written exactly once.
    hn_ref[0] = h0
    hn_ref[1] = h1


def fuse_gru_layer(wih_t, whh_t, bih, bhh):
    """Per-layer weight prep.

    Returns:
      wx  (in_dim, 3H) bf16 : input-path weights  [r | z | n]
      bx  (1, 3H)      f32  : [b_ir+b_hr | b_iz+b_hz | b_in]  (folded into gi)
      wh  (H, 3H)      bf16 : hidden-path weights [r | z | n]
      bhn (1, H)       f32  : b_hn, kept separate (r multiplies W_hn h + b_hn)
    """
    wx = wih_t.astype(jnp.bfloat16)
    bx = jnp.concatenate([bih[:, :2 * H] + bhh[:, :2 * H],
                          bih[:, 2 * H:]], axis=1).astype(jnp.float32)
    wh = whh_t.astype(jnp.bfloat16)
    bhn = bhh[:, 2 * H:].astype(jnp.float32)
    return wx, bx, wh, bhn


def fuse_params(params):
    """One-time host-side weight prep (forward pass stays one pallas_call)."""
    wih0, whh0, bih0, bhh0, wih1, whh1, bih1, bhh1 = params
    return (*fuse_gru_layer(wih0, whh0, bih0, bhh0),
            *fuse_gru_layer(wih1, whh1, bih1, bhh1))


@jax.jit
def rnn_forward(x, fused_params):
    """x: (B, T, I) batch_first.  Returns (output (B, T, H), hn (L, B, H))."""
    wx0, bx0, wh0, bhn0, wx1, bx1, wh1, bhn1 = fused_params
    Bx, T, _ = x.shape

    # One-time layout prep outside the latency-bound kernel: time-major,
    # flattened rows so per-step slices inside the kernel are contiguous.
    x_tm = jnp.transpose(x, (1, 0, 2)).reshape(T * Bx, I)

    cost = pl.CostEstimate(
        flops=2 * T * Bx * 3 * H * (I + 3 * H),
        transcendentals=3 * L * T * Bx * H,
        bytes_accessed=(T * Bx * I * 4                 # x
                        + (I + 3 * H) * 3 * H * 2      # bf16 weights
                        + 2 * (3 * H + H) * 4          # biases
                        + T * Bx * H * 4               # output
                        + L * Bx * H * 4),             # hn
    )

    out_tm, hn = pl.pallas_call(
        gru_kernel,
        out_shape=(jax.ShapeDtypeStruct((T, Bx, H), jnp.float32),
                   jax.ShapeDtypeStruct((L, Bx, H), jnp.float32)),
        in_specs=[pl.BlockSpec(memory_space=pltpu.MemorySpace.VMEM)] * 9,
        out_specs=(pl.BlockSpec(memory_space=pltpu.MemorySpace.VMEM),
                   pl.BlockSpec(memory_space=pltpu.MemorySpace.VMEM)),
        cost_estimate=cost,
    )(x_tm, wx0, bx0, wh0, bhn0, wx1, bx1, wh1, bhn1)

    # Transpose the tiny time-major result back to batch_first in the wrapper.
    return jnp.transpose(out_tm, (1, 0, 2)), hn


def init_params(key):
    """Deterministic init, PyTorch-style uniform(-1/sqrt(H), 1/sqrt(H)).
    Weights stored transposed: W_ih^T (in_dim, 3H), W_hh^T (H, 3H)."""
    k = 1.0 / jnp.sqrt(jnp.float32(H))
    keys = jax.random.split(key, 8)

    def u(kk, shape):
        return jax.random.uniform(kk, shape, jnp.float32, -k, k)

    wih0 = u(keys[0], (I, 3 * H))
    whh0 = u(keys[1], (H, 3 * H))
    bih0 = u(keys[2], (1, 3 * H))
    bhh0 = u(keys[3], (1, 3 * H))
    wih1 = u(keys[4], (H, 3 * H))
    whh1 = u(keys[5], (H, 3 * H))
    bih1 = u(keys[6], (1, 3 * H))
    bhh1 = u(keys[7], (1, 3 * H))
    return (wih0, whh0, bih0, bhh0, wih1, whh1, bih1, bhh1)


def gru_ref(x, params, matmul_dtype=jnp.float32):
    """Pure-JAX reference of the same 2-layer GRU (PyTorch equations).

    matmul_dtype lets us mirror the kernel's bf16 matmul-operand precision
    (accumulation stays f32 in both cases)."""
    wih0, whh0, bih0, bhh0, wih1, whh1, bih1, bhh1 = params
    Bx, T, _ = x.shape

    def cell(x_t, h, wih, whh, bih, bhh):
        gi = jnp.dot(x_t.astype(matmul_dtype), wih.astype(matmul_dtype),
                     preferred_element_type=jnp.float32) + bih
        gh = jnp.dot(h.astype(matmul_dtype), whh.astype(matmul_dtype),
                     preferred_element_type=jnp.float32) + bhh
        r = jax.nn.sigmoid(gi[:, :H] + gh[:, :H])
        z = jax.nn.sigmoid(gi[:, H:2 * H] + gh[:, H:2 * H])
        n = jnp.tanh(gi[:, 2 * H:] + r * gh[:, 2 * H:])
        return (1.0 - z) * n + z * h

    h0 = jnp.zeros((Bx, H), jnp.float32)
    h1 = jnp.zeros((Bx, H), jnp.float32)
    outs = []
    for t in range(T):
        x_t = x[:, t, :]
        h0 = cell(x_t, h0, wih0, whh0, bih0, bhh0)
        h1 = cell(h0, h1, wih1, whh1, bih1, bhh1)
        outs.append(h1)
    return jnp.stack(outs, axis=1), jnp.stack([h0, h1], axis=0)


if __name__ == "__main__":
    key = jax.random.PRNGKey(0)
    k_x, k_p = jax.random.split(key)

    T = 8
    x = jax.random.normal(k_x, (B, T, I), jnp.float32)   # (batch=3, seq=8, input=26)
    params = init_params(k_p)
    fused = fuse_params(params)                           # one-time weight prep

    output, hn = rnn_forward(x, fused)
    jax.block_until_ready((output, hn))

    assert output.shape == (B, T, H) and hn.shape == (L, B, H)

    # Tight check against a reference that mirrors the kernel's bf16 matmul
    # operands (f32 accumulation) — validates gate fusion / recurrence.
    out_bf, hn_bf = gru_ref(x, params, jnp.bfloat16)
    assert jnp.allclose(output, out_bf, atol=1e-3, rtol=1e-3)
    assert jnp.allclose(hn, hn_bf, atol=1e-3, rtol=1e-3)

    # Loose check against the full-f32 reference (PyTorch semantics); the
    # tolerance accounts for bf16 matmul operands (accumulation stays f32).
    out_f32, hn_f32 = gru_ref(x, params, jnp.float32)
    assert jnp.allclose(output, out_f32, atol=5e-2, rtol=5e-2)
    assert jnp.allclose(hn, hn_f32, atol=5e-2, rtol=5e-2)

    print("KERNEL_OK")
</pallas_src>

<mosaic_0001>
module attributes {stable_mosaic.version = 11 : i64} {
  func.func @gru_kernel(%arg0: memref<24x26xf32, #tpu.memory_space<vmem>>, %arg1: memref<26x51xbf16, #tpu.memory_space<vmem>>, %arg2: memref<1x51xf32, #tpu.memory_space<vmem>>, %arg3: memref<17x51xbf16, #tpu.memory_space<vmem>>, %arg4: memref<1x17xf32, #tpu.memory_space<vmem>>, %arg5: memref<17x51xbf16, #tpu.memory_space<vmem>>, %arg6: memref<1x51xf32, #tpu.memory_space<vmem>>, %arg7: memref<17x51xbf16, #tpu.memory_space<vmem>>, %arg8: memref<1x17xf32, #tpu.memory_space<vmem>>, %arg9: memref<8x3x17xf32, #tpu.memory_space<vmem>>, %arg10: memref<2x3x17xf32, #tpu.memory_space<vmem>>) attributes {dimension_semantics = [], scalar_prefetch = 0 : i64, scratch_operands = 0 : i64, tpu.core_type = #tpu.core_type<tc>} {
    %c0 = arith.constant 0 : index
    %c0_0 = arith.constant 0 : index
    %0 = vector.load %arg1[%c0, %c0_0] : memref<26x51xbf16, #tpu.memory_space<vmem>>, vector<26x51xbf16>
    %c0_1 = arith.constant 0 : index
    %c0_2 = arith.constant 0 : index
    %1 = vector.load %arg3[%c0_1, %c0_2] : memref<17x51xbf16, #tpu.memory_space<vmem>>, vector<17x51xbf16>
    %c0_3 = arith.constant 0 : index
    %c0_4 = arith.constant 0 : index
    %2 = vector.load %arg5[%c0_3, %c0_4] : memref<17x51xbf16, #tpu.memory_space<vmem>>, vector<17x51xbf16>
    %c0_5 = arith.constant 0 : index
    %c0_6 = arith.constant 0 : index
    %3 = vector.load %arg7[%c0_5, %c0_6] : memref<17x51xbf16, #tpu.memory_space<vmem>>, vector<17x51xbf16>
    %c0_7 = arith.constant 0 : index
    %c0_8 = arith.constant 0 : index
    %4 = vector.load %arg2[%c0_7, %c0_8] : memref<1x51xf32, #tpu.memory_space<vmem>>, vector<1x51xf32>
    %5 = vector.shape_cast %4 : vector<1x51xf32> to vector<1x51xf32>
    %6 = vector.broadcast %5 : vector<1x51xf32> to vector<24x51xf32>
    %c0_9 = arith.constant 0 : index
    %c0_10 = arith.constant 0 : index
    %7 = vector.load %arg6[%c0_9, %c0_10] : memref<1x51xf32, #tpu.memory_space<vmem>>, vector<1x51xf32>
    %8 = vector.shape_cast %7 : vector<1x51xf32> to vector<1x51xf32>
    %9 = vector.broadcast %8 : vector<1x51xf32> to vector<24x51xf32>
    %c0_11 = arith.constant 0 : index
    %c0_12 = arith.constant 0 : index
    %10 = vector.load %arg4[%c0_11, %c0_12] : memref<1x17xf32, #tpu.memory_space<vmem>>, vector<1x17xf32>
    %11 = vector.shape_cast %10 : vector<1x17xf32> to vector<1x17xf32>
    %12 = vector.broadcast %11 : vector<1x17xf32> to vector<3x17xf32>
    %c0_13 = arith.constant 0 : index
    %c0_14 = arith.constant 0 : index
    %13 = vector.load %arg8[%c0_13, %c0_14] : memref<1x17xf32, #tpu.memory_space<vmem>>, vector<1x17xf32>
    %14 = vector.shape_cast %13 : vector<1x17xf32> to vector<1x17xf32>
    %15 = vector.broadcast %14 : vector<1x17xf32> to vector<3x17xf32>
    %c0_15 = arith.constant 0 : index
    %c0_16 = arith.constant 0 : index
    %16 = vector.load %arg0[%c0_15, %c0_16] : memref<24x26xf32, #tpu.memory_space<vmem>>, vector<24x26xf32>
    %17 = arith.truncf %16 : vector<24x26xf32> to vector<24x26xbf16>
    %cst = arith.constant dense<0.000000e+00> : vector<24x51xf32>
    %18 = tpu.matmul %17, %0, %cst {dimension_numbers = #tpu.dot_dimension_numbers<[1], [0], [0], [1], [0, 0, 1, 1], [], []>} : vector<24x26xbf16>, vector<26x51xbf16>, vector<24x51xf32> -> vector<24x51xf32>
    %19 = arith.addf %18, %6 : vector<24x51xf32>
    %cst_17 = arith.constant 0.000000e+00 : f32
    %20 = vector.broadcast %cst_17 : f32 to vector<3x17xf32>
    %21 = vector.extract_strided_slice %19 {offsets = [0, 0], sizes = [3, 51], strides = [1, 1]} : vector<24x51xf32> to vector<3x51xf32>
    %22 = arith.truncf %20 : vector<3x17xf32> to vector<3x17xbf16>
    %cst_18 = arith.constant dense<0.000000e+00> : vector<3x51xf32>
    %23 = tpu.matmul %22, %1, %cst_18 {dimension_numbers = #tpu.dot_dimension_numbers<[1], [0], [0], [1], [0, 0, 1, 1], [], []>} : vector<3x17xbf16>, vector<17x51xbf16>, vector<3x51xf32> -> vector<3x51xf32>
    %24 = vector.extract_strided_slice %21 {offsets = [0, 0], sizes = [3, 17], strides = [1, 1]} : vector<3x51xf32> to vector<3x17xf32>
    %25 = vector.extract_strided_slice %23 {offsets = [0, 0], sizes = [3, 17], strides = [1, 1]} : vector<3x51xf32> to vector<3x17xf32>
    %26 = arith.addf %24, %25 : vector<3x17xf32>
    %27 = arith.negf %26 : vector<3x17xf32>
    %28 = math.exp %27 : vector<3x17xf32>
    %cst_19 = arith.constant 1.000000e+00 : f32
    %29 = vector.broadcast %cst_19 : f32 to vector<3x17xf32>
    %30 = arith.addf %29, %28 : vector<3x17xf32>
    %31 = arith.divf %29, %30 : vector<3x17xf32>
    %32 = vector.extract_strided_slice %21 {offsets = [0, 17], sizes = [3, 17], strides = [1, 1]} : vector<3x51xf32> to vector<3x17xf32>
    %33 = vector.extract_strided_slice %23 {offsets = [0, 17], sizes = [3, 17], strides = [1, 1]} : vector<3x51xf32> to vector<3x17xf32>
    %34 = arith.addf %32, %33 : vector<3x17xf32>
    %35 = arith.negf %34 : vector<3x17xf32>
    %36 = math.exp %35 : vector<3x17xf32>
    %cst_20 = arith.constant 1.000000e+00 : f32
    %37 = vector.broadcast %cst_20 : f32 to vector<3x17xf32>
    %38 = arith.addf %37, %36 : vector<3x17xf32>
    %39 = arith.divf %37, %38 : vector<3x17xf32>
    %40 = vector.extract_strided_slice %21 {offsets = [0, 34], sizes = [3, 17], strides = [1, 1]} : vector<3x51xf32> to vector<3x17xf32>
    %41 = vector.extract_strided_slice %23 {offsets = [0, 34], sizes = [3, 17], strides = [1, 1]} : vector<3x51xf32> to vector<3x17xf32>
    %42 = arith.addf %41, %12 : vector<3x17xf32>
    %43 = arith.mulf %31, %42 : vector<3x17xf32>
    %44 = arith.addf %40, %43 : vector<3x17xf32>
    %45 = math.tanh %44 : vector<3x17xf32>
    %cst_21 = arith.constant 1.000000e+00 : f32
    %46 = vector.broadcast %cst_21 : f32 to vector<3x17xf32>
    %47 = arith.subf %46, %39 : vector<3x17xf32>
    %48 = arith.mulf %47, %45 : vector<3x17xf32>
    %49 = arith.mulf %39, %20 : vector<3x17xf32>
    %50 = arith.addf %48, %49 : vector<3x17xf32>
    %51 = vector.extract_strided_slice %19 {offsets = [3, 0], sizes = [3, 51], strides = [1, 1]} : vector<24x51xf32> to vector<3x51xf32>
    %52 = arith.truncf %50 : vector<3x17xf32> to vector<3x17xbf16>
    %cst_22 = arith.constant dense<0.000000e+00> : vector<3x51xf32>
    %53 = tpu.matmul %52, %1, %cst_22 {dimension_numbers = #tpu.dot_dimension_numbers<[1], [0], [0], [1], [0, 0, 1, 1], [], []>} : vector<3x17xbf16>, vector<17x51xbf16>, vector<3x51xf32> -> vector<3x51xf32>
    %54 = vector.extract_strided_slice %51 {offsets = [0, 0], sizes = [3, 17], strides = [1, 1]} : vector<3x51xf32> to vector<3x17xf32>
    %55 = vector.extract_strided_slice %53 {offsets = [0, 0], sizes = [3, 17], strides = [1, 1]} : vector<3x51xf32> to vector<3x17xf32>
    %56 = arith.addf %54, %55 : vector<3x17xf32>
    %57 = arith.negf %56 : vector<3x17xf32>
    %58 = math.exp %57 : vector<3x17xf32>
    %cst_23 = arith.constant 1.000000e+00 : f32
    %59 = vector.broadcast %cst_23 : f32 to vector<3x17xf32>
    %60 = arith.addf %59, %58 : vector<3x17xf32>
    %61 = arith.divf %59, %60 : vector<3x17xf32>
    %62 = vector.extract_strided_slice %51 {offsets = [0, 17], sizes = [3, 17], strides = [1, 1]} : vector<3x51xf32> to vector<3x17xf32>
    %63 = vector.extract_strided_slice %53 {offsets = [0, 17], sizes = [3, 17], strides = [1, 1]} : vector<3x51xf32> to vector<3x17xf32>
    %64 = arith.addf %62, %63 : vector<3x17xf32>
    %65 = arith.negf %64 : vector<3x17xf32>
    %66 = math.exp %65 : vector<3x17xf32>
    %cst_24 = arith.constant 1.000000e+00 : f32
    %67 = vector.broadcast %cst_24 : f32 to vector<3x17xf32>
    %68 = arith.addf %67, %66 : vector<3x17xf32>
    %69 = arith.divf %67, %68 : vector<3x17xf32>
    %70 = vector.extract_strided_slice %51 {offsets = [0, 34], sizes = [3, 17], strides = [1, 1]} : vector<3x51xf32> to vector<3x17xf32>
    %71 = vector.extract_strided_slice %53 {offsets = [0, 34], sizes = [3, 17], strides = [1, 1]} : vector<3x51xf32> to vector<3x17xf32>
    %72 = arith.addf %71, %12 : vector<3x17xf32>
    %73 = arith.mulf %61, %72 : vector<3x17xf32>
    %74 = arith.addf %70, %73 : vector<3x17xf32>
    %75 = math.tanh %74 : vector<3x17xf32>
    %cst_25 = arith.constant 1.000000e+00 : f32
    %76 = vector.broadcast %cst_25 : f32 to vector<3x17xf32>
    %77 = arith.subf %76, %69 : vector<3x17xf32>
    %78 = arith.mulf %77, %75 : vector<3x17xf32>
    %79 = arith.mulf %69, %50 : vector<3x17xf32>
    %80 = arith.addf %78, %79 : vector<3x17xf32>
    %81 = vector.extract_strided_slice %19 {offsets = [6, 0], sizes = [3, 51], strides = [1, 1]} : vector<24x51xf32> to vector<3x51xf32>
    %82 = arith.truncf %80 : vector<3x17xf32> to vector<3x17xbf16>
    %cst_26 = arith.constant dense<0.000000e+00> : vector<3x51xf32>
    %83 = tpu.matmul %82, %1, %cst_26 {dimension_numbers = #tpu.dot_dimension_numbers<[1], [0], [0], [1], [0, 0, 1, 1], [], []>} : vector<3x17xbf16>, vector<17x51xbf16>, vector<3x51xf32> -> vector<3x51xf32>
    %84 = vector.extract_strided_slice %81 {offsets = [0, 0], sizes = [3, 17], strides = [1, 1]} : vector<3x51xf32> to vector<3x17xf32>
    %85 = vector.extract_strided_slice %83 {offsets = [0, 0], sizes = [3, 17], strides = [1, 1]} : vector<3x51xf32> to vector<3x17xf32>
    %86 = arith.addf %84, %85 : vector<3x17xf32>
    %87 = arith.negf %86 : vector<3x17xf32>
    %88 = math.exp %87 : vector<3x17xf32>
    %cst_27 = arith.constant 1.000000e+00 : f32
    %89 = vector.broadcast %cst_27 : f32 to vector<3x17xf32>
    %90 = arith.addf %89, %88 : vector<3x17xf32>
    %91 = arith.divf %89, %90 : vector<3x17xf32>
    %92 = vector.extract_strided_slice %81 {offsets = [0, 17], sizes = [3, 17], strides = [1, 1]} : vector<3x51xf32> to vector<3x17xf32>
    %93 = vector.extract_strided_slice %83 {offsets = [0, 17], sizes = [3, 17], strides = [1, 1]} : vector<3x51xf32> to vector<3x17xf32>
    %94 = arith.addf %92, %93 : vector<3x17xf32>
    %95 = arith.negf %94 : vector<3x17xf32>
    %96 = math.exp %95 : vector<3x17xf32>
    %cst_28 = arith.constant 1.000000e+00 : f32
    %97 = vector.broadcast %cst_28 : f32 to vector<3x17xf32>
    %98 = arith.addf %97, %96 : vector<3x17xf32>
    %99 = arith.divf %97, %98 : vector<3x17xf32>
    %100 = vector.extract_strided_slice %81 {offsets = [0, 34], sizes = [3, 17], strides = [1, 1]} : vector<3x51xf32> to vector<3x17xf32>
    %101 = vector.extract_strided_slice %83 {offsets = [0, 34], sizes = [3, 17], strides = [1, 1]} : vector<3x51xf32> to vector<3x17xf32>
    %102 = arith.addf %101, %12 : vector<3x17xf32>
    %103 = arith.mulf %91, %102 : vector<3x17xf32>
    %104 = arith.addf %100, %103 : vector<3x17xf32>
    %105 = math.tanh %104 : vector<3x17xf32>
    %cst_29 = arith.constant 1.000000e+00 : f32
    %106 = vector.broadcast %cst_29 : f32 to vector<3x17xf32>
    %107 = arith.subf %106, %99 : vector<3x17xf32>
    %108 = arith.mulf %107, %105 : vector<3x17xf32>
    %109 = arith.mulf %99, %80 : vector<3x17xf32>
    %110 = arith.addf %108, %109 : vector<3x17xf32>
    %111 = vector.extract_strided_slice %19 {offsets = [9, 0], sizes = [3, 51], strides = [1, 1]} : vector<24x51xf32> to vector<3x51xf32>
    %112 = arith.truncf %110 : vector<3x17xf32> to vector<3x17xbf16>
    %cst_30 = arith.constant dense<0.000000e+00> : vector<3x51xf32>
    %113 = tpu.matmul %112, %1, %cst_30 {dimension_numbers = #tpu.dot_dimension_numbers<[1], [0], [0], [1], [0, 0, 1, 1], [], []>} : vector<3x17xbf16>, vector<17x51xbf16>, vector<3x51xf32> -> vector<3x51xf32>
    %114 = vector.extract_strided_slice %111 {offsets = [0, 0], sizes = [3, 17], strides = [1, 1]} : vector<3x51xf32> to vector<3x17xf32>
    %115 = vector.extract_strided_slice %113 {offsets = [0, 0], sizes = [3, 17], strides = [1, 1]} : vector<3x51xf32> to vector<3x17xf32>
    %116 = arith.addf %114, %115 : vector<3x17xf32>
    %117 = arith.negf %116 : vector<3x17xf32>
    %118 = math.exp %117 : vector<3x17xf32>
    %cst_31 = arith.constant 1.000000e+00 : f32
    %119 = vector.broadcast %cst_31 : f32 to vector<3x17xf32>
    %120 = arith.addf %119, %118 : vector<3x17xf32>
    %121 = arith.divf %119, %120 : vector<3x17xf32>
    %122 = vector.extract_strided_slice %111 {offsets = [0, 17], sizes = [3, 17], strides = [1, 1]} : vector<3x51xf32> to vector<3x17xf32>
    %123 = vector.extract_strided_slice %113 {offsets = [0, 17], sizes = [3, 17], strides = [1, 1]} : vector<3x51xf32> to vector<3x17xf32>
    %124 = arith.addf %122, %123 : vector<3x17xf32>
    %125 = arith.negf %124 : vector<3x17xf32>
    %126 = math.exp %125 : vector<3x17xf32>
    %cst_32 = arith.constant 1.000000e+00 : f32
    %127 = vector.broadcast %cst_32 : f32 to vector<3x17xf32>
    %128 = arith.addf %127, %126 : vector<3x17xf32>
    %129 = arith.divf %127, %128 : vector<3x17xf32>
    %130 = vector.extract_strided_slice %111 {offsets = [0, 34], sizes = [3, 17], strides = [1, 1]} : vector<3x51xf32> to vector<3x17xf32>
    %131 = vector.extract_strided_slice %113 {offsets = [0, 34], sizes = [3, 17], strides = [1, 1]} : vector<3x51xf32> to vector<3x17xf32>
    %132 = arith.addf %131, %12 : vector<3x17xf32>
    %133 = arith.mulf %121, %132 : vector<3x17xf32>
    %134 = arith.addf %130, %133 : vector<3x17xf32>
    %135 = math.tanh %134 : vector<3x17xf32>
    %cst_33 = arith.constant 1.000000e+00 : f32
    %136 = vector.broadcast %cst_33 : f32 to vector<3x17xf32>
    %137 = arith.subf %136, %129 : vector<3x17xf32>
    %138 = arith.mulf %137, %135 : vector<3x17xf32>
    %139 = arith.mulf %129, %110 : vector<3x17xf32>
    %140 = arith.addf %138, %139 : vector<3x17xf32>
    %141 = vector.extract_strided_slice %19 {offsets = [12, 0], sizes = [3, 51], strides = [1, 1]} : vector<24x51xf32> to vector<3x51xf32>
    %142 = arith.truncf %140 : vector<3x17xf32> to vector<3x17xbf16>
    %cst_34 = arith.constant dense<0.000000e+00> : vector<3x51xf32>
    %143 = tpu.matmul %142, %1, %cst_34 {dimension_numbers = #tpu.dot_dimension_numbers<[1], [0], [0], [1], [0, 0, 1, 1], [], []>} : vector<3x17xbf16>, vector<17x51xbf16>, vector<3x51xf32> -> vector<3x51xf32>
    %144 = vector.extract_strided_slice %141 {offsets = [0, 0], sizes = [3, 17], strides = [1, 1]} : vector<3x51xf32> to vector<3x17xf32>
    %145 = vector.extract_strided_slice %143 {offsets = [0, 0], sizes = [3, 17], strides = [1, 1]} : vector<3x51xf32> to vector<3x17xf32>
    %146 = arith.addf %144, %145 : vector<3x17xf32>
    %147 = arith.negf %146 : vector<3x17xf32>
    %148 = math.exp %147 : vector<3x17xf32>
    %cst_35 = arith.constant 1.000000e+00 : f32
    %149 = vector.broadcast %cst_35 : f32 to vector<3x17xf32>
    %150 = arith.addf %149, %148 : vector<3x17xf32>
    %151 = arith.divf %149, %150 : vector<3x17xf32>
    %152 = vector.extract_strided_slice %141 {offsets = [0, 17], sizes = [3, 17], strides = [1, 1]} : vector<3x51xf32> to vector<3x17xf32>
    %153 = vector.extract_strided_slice %143 {offsets = [0, 17], sizes = [3, 17], strides = [1, 1]} : vector<3x51xf32> to vector<3x17xf32>
    %154 = arith.addf %152, %153 : vector<3x17xf32>
    %155 = arith.negf %154 : vector<3x17xf32>
    %156 = math.exp %155 : vector<3x17xf32>
    %cst_36 = arith.constant 1.000000e+00 : f32
    %157 = vector.broadcast %cst_36 : f32 to vector<3x17xf32>
    %158 = arith.addf %157, %156 : vector<3x17xf32>
    %159 = arith.divf %157, %158 : vector<3x17xf32>
    %160 = vector.extract_strided_slice %141 {offsets = [0, 34], sizes = [3, 17], strides = [1, 1]} : vector<3x51xf32> to vector<3x17xf32>
    %161 = vector.extract_strided_slice %143 {offsets = [0, 34], sizes = [3, 17], strides = [1, 1]} : vector<3x51xf32> to vector<3x17xf32>
    %162 = arith.addf %161, %12 : vector<3x17xf32>
    %163 = arith.mulf %151, %162 : vector<3x17xf32>
    %164 = arith.addf %160, %163 : vector<3x17xf32>
    %165 = math.tanh %164 : vector<3x17xf32>
    %cst_37 = arith.constant 1.000000e+00 : f32
    %166 = vector.broadcast %cst_37 : f32 to vector<3x17xf32>
    %167 = arith.subf %166, %159 : vector<3x17xf32>
    %168 = arith.mulf %167, %165 : vector<3x17xf32>
    %169 = arith.mulf %159, %140 : vector<3x17xf32>
    %170 = arith.addf %168, %169 : vector<3x17xf32>
    %171 = vector.extract_strided_slice %19 {offsets = [15, 0], sizes = [3, 51], strides = [1, 1]} : vector<24x51xf32> to vector<3x51xf32>
    %172 = arith.truncf %170 : vector<3x17xf32> to vector<3x17xbf16>
    %cst_38 = arith.constant dense<0.000000e+00> : vector<3x51xf32>
    %173 = tpu.matmul %172, %1, %cst_38 {dimension_numbers = #tpu.dot_dimension_numbers<[1], [0], [0], [1], [0, 0, 1, 1], [], []>} : vector<3x17xbf16>, vector<17x51xbf16>, vector<3x51xf32> -> vector<3x51xf32>
    %174 = vector.extract_strided_slice %171 {offsets = [0, 0], sizes = [3, 17], strides = [1, 1]} : vector<3x51xf32> to vector<3x17xf32>
    %175 = vector.extract_strided_slice %173 {offsets = [0, 0], sizes = [3, 17], strides = [1, 1]} : vector<3x51xf32> to vector<3x17xf32>
    %176 = arith.addf %174, %175 : vector<3x17xf32>
    %177 = arith.negf %176 : vector<3x17xf32>
    %178 = math.exp %177 : vector<3x17xf32>
    %cst_39 = arith.constant 1.000000e+00 : f32
    %179 = vector.broadcast %cst_39 : f32 to vector<3x17xf32>
    %180 = arith.addf %179, %178 : vector<3x17xf32>
    %181 = arith.divf %179, %180 : vector<3x17xf32>
    %182 = vector.extract_strided_slice %171 {offsets = [0, 17], sizes = [3, 17], strides = [1, 1]} : vector<3x51xf32> to vector<3x17xf32>
    %183 = vector.extract_strided_slice %173 {offsets = [0, 17], sizes = [3, 17], strides = [1, 1]} : vector<3x51xf32> to vector<3x17xf32>
    %184 = arith.addf %182, %183 : vector<3x17xf32>
    %185 = arith.negf %184 : vector<3x17xf32>
    %186 = math.exp %185 : vector<3x17xf32>
    %cst_40 = arith.constant 1.000000e+00 : f32
    %187 = vector.broadcast %cst_40 : f32 to vector<3x17xf32>
    %188 = arith.addf %187, %186 : vector<3x17xf32>
    %189 = arith.divf %187, %188 : vector<3x17xf32>
    %190 = vector.extract_strided_slice %171 {offsets = [0, 34], sizes = [3, 17], strides = [1, 1]} : vector<3x51xf32> to vector<3x17xf32>
    %191 = vector.extract_strided_slice %173 {offsets = [0, 34], sizes = [3, 17], strides = [1, 1]} : vector<3x51xf32> to vector<3x17xf32>
    %192 = arith.addf %191, %12 : vector<3x17xf32>
    %193 = arith.mulf %181, %192 : vector<3x17xf32>
    %194 = arith.addf %190, %193 : vector<3x17xf32>
    %195 = math.tanh %194 : vector<3x17xf32>
    %cst_41 = arith.constant 1.000000e+00 : f32
    %196 = vector.broadcast %cst_41 : f32 to vector<3x17xf32>
    %197 = arith.subf %196, %189 : vector<3x17xf32>
    %198 = arith.mulf %197, %195 : vector<3x17xf32>
    %199 = arith.mulf %189, %170 : vector<3x17xf32>
    %200 = arith.addf %198, %199 : vector<3x17xf32>
    %201 = vector.extract_strided_slice %19 {offsets = [18, 0], sizes = [3, 51], strides = [1, 1]} : vector<24x51xf32> to vector<3x51xf32>
    %202 = arith.truncf %200 : vector<3x17xf32> to vector<3x17xbf16>
    %cst_42 = arith.constant dense<0.000000e+00> : vector<3x51xf32>
    %203 = tpu.matmul %202, %1, %cst_42 {dimension_numbers = #tpu.dot_dimension_numbers<[1], [0], [0], [1], [0, 0, 1, 1], [], []>} : vector<3x17xbf16>, vector<17x51xbf16>, vector<3x51xf32> -> vector<3x51xf32>
    %204 = vector.extract_strided_slice %201 {offsets = [0, 0], sizes = [3, 17], strides = [1, 1]} : vector<3x51xf32> to vector<3x17xf32>
    %205 = vector.extract_strided_slice %203 {offsets = [0, 0], sizes = [3, 17], strides = [1, 1]} : vector<3x51xf32> to vector<3x17xf32>
    %206 = arith.addf %204, %205 : vector<3x17xf32>
    %207 = arith.negf %206 : vector<3x17xf32>
    %208 = math.exp %207 : vector<3x17xf32>
    %cst_43 = arith.constant 1.000000e+00 : f32
    %209 = vector.broadcast %cst_43 : f32 to vector<3x17xf32>
    %210 = arith.addf %209, %208 : vector<3x17xf32>
    %211 = arith.divf %209, %210 : vector<3x17xf32>
    %212 = vector.extract_strided_slice %201 {offsets = [0, 17], sizes = [3, 17], strides = [1, 1]} : vector<3x51xf32> to vector<3x17xf32>
    %213 = vector.extract_strided_slice %203 {offsets = [0, 17], sizes = [3, 17], strides = [1, 1]} : vector<3x51xf32> to vector<3x17xf32>
    %214 = arith.addf %212, %213 : vector<3x17xf32>
    %215 = arith.negf %214 : vector<3x17xf32>
    %216 = math.exp %215 : vector<3x17xf32>
    %cst_44 = arith.constant 1.000000e+00 : f32
    %217 = vector.broadcast %cst_44 : f32 to vector<3x17xf32>
    %218 = arith.addf %217, %216 : vector<3x17xf32>
    %219 = arith.divf %217, %218 : vector<3x17xf32>
    %220 = vector.extract_strided_slice %201 {offsets = [0, 34], sizes = [3, 17], strides = [1, 1]} : vector<3x51xf32> to vector<3x17xf32>
    %221 = vector.extract_strided_slice %203 {offsets = [0, 34], sizes = [3, 17], strides = [1, 1]} : vector<3x51xf32> to vector<3x17xf32>
    %222 = arith.addf %221, %12 : vector<3x17xf32>
    %223 = arith.mulf %211, %222 : vector<3x17xf32>
    %224 = arith.addf %220, %223 : vector<3x17xf32>
    %225 = math.tanh %224 : vector<3x17xf32>
    %cst_45 = arith.constant 1.000000e+00 : f32
    %226 = vector.broadcast %cst_45 : f32 to vector<3x17xf32>
    %227 = arith.subf %226, %219 : vector<3x17xf32>
    %228 = arith.mulf %227, %225 : vector<3x17xf32>
    %229 = arith.mulf %219, %200 : vector<3x17xf32>
    %230 = arith.addf %228, %229 : vector<3x17xf32>
    %231 = vector.extract_strided_slice %19 {offsets = [21, 0], sizes = [3, 51], strides = [1, 1]} : vector<24x51xf32> to vector<3x51xf32>
    %232 = arith.truncf %230 : vector<3x17xf32> to vector<3x17xbf16>
    %cst_46 = arith.constant dense<0.000000e+00> : vector<3x51xf32>
    %233 = tpu.matmul %232, %1, %cst_46 {dimension_numbers = #tpu.dot_dimension_numbers<[1], [0], [0], [1], [0, 0, 1, 1], [], []>} : vector<3x17xbf16>, vector<17x51xbf16>, vector<3x51xf32> -> vector<3x51xf32>
    %234 = vector.extract_strided_slice %231 {offsets = [0, 0], sizes = [3, 17], strides = [1, 1]} : vector<3x51xf32> to vector<3x17xf32>
    %235 = vector.extract_strided_slice %233 {offsets = [0, 0], sizes = [3, 17], strides = [1, 1]} : vector<3x51xf32> to vector<3x17xf32>
    %236 = arith.addf %234, %235 : vector<3x17xf32>
    %237 = arith.negf %236 : vector<3x17xf32>
    %238 = math.exp %237 : vector<3x17xf32>
    %cst_47 = arith.constant 1.000000e+00 : f32
    %239 = vector.broadcast %cst_47 : f32 to vector<3x17xf32>
    %240 = arith.addf %239, %238 : vector<3x17xf32>
    %241 = arith.divf %239, %240 : vector<3x17xf32>
    %242 = vector.extract_strided_slice %231 {offsets = [0, 17], sizes = [3, 17], strides = [1, 1]} : vector<3x51xf32> to vector<3x17xf32>
    %243 = vector.extract_strided_slice %233 {offsets = [0, 17], sizes = [3, 17], strides = [1, 1]} : vector<3x51xf32> to vector<3x17xf32>
    %244 = arith.addf %242, %243 : vector<3x17xf32>
    %245 = arith.negf %244 : vector<3x17xf32>
    %246 = math.exp %245 : vector<3x17xf32>
    %cst_48 = arith.constant 1.000000e+00 : f32
    %247 = vector.broadcast %cst_48 : f32 to vector<3x17xf32>
    %248 = arith.addf %247, %246 : vector<3x17xf32>
    %249 = arith.divf %247, %248 : vector<3x17xf32>
    %250 = vector.extract_strided_slice %231 {offsets = [0, 34], sizes = [3, 17], strides = [1, 1]} : vector<3x51xf32> to vector<3x17xf32>
    %251 = vector.extract_strided_slice %233 {offsets = [0, 34], sizes = [3, 17], strides = [1, 1]} : vector<3x51xf32> to vector<3x17xf32>
    %252 = arith.addf %251, %12 : vector<3x17xf32>
    %253 = arith.mulf %241, %252 : vector<3x17xf32>
    %254 = arith.addf %250, %253 : vector<3x17xf32>
    %255 = math.tanh %254 : vector<3x17xf32>
    %cst_49 = arith.constant 1.000000e+00 : f32
    %256 = vector.broadcast %cst_49 : f32 to vector<3x17xf32>
    %257 = arith.subf %256, %249 : vector<3x17xf32>
    %258 = arith.mulf %257, %255 : vector<3x17xf32>
    %259 = arith.mulf %249, %230 : vector<3x17xf32>
    %260 = arith.addf %258, %259 : vector<3x17xf32>
    %261 = tpu.concatenate %50, %80, %110, %140, %170, %200, %230, %260 in 0 : vector<3x17xf32>, vector<3x17xf32>, vector<3x17xf32>, vector<3x17xf32>, vector<3x17xf32>, vector<3x17xf32>, vector<3x17xf32>, vector<3x17xf32> -> vector<24x17xf32>
    %262 = arith.truncf %261 : vector<24x17xf32> to vector<24x17xbf16>
    %cst_50 = arith.constant dense<0.000000e+00> : vector<24x51xf32>
    %263 = tpu.matmul %262, %2, %cst_50 {dimension_numbers = #tpu.dot_dimension_numbers<[1], [0], [0], [1], [0, 0, 1, 1], [], []>} : vector<24x17xbf16>, vector<17x51xbf16>, vector<24x51xf32> -> vector<24x51xf32>
    %264 = arith.addf %263, %9 : vector<24x51xf32>
    %cst_51 = arith.constant 0.000000e+00 : f32
    %265 = vector.broadcast %cst_51 : f32 to vector<3x17xf32>
    %266 = vector.extract_strided_slice %264 {offsets = [0, 0], sizes = [3, 51], strides = [1, 1]} : vector<24x51xf32> to vector<3x51xf32>
    %267 = arith.truncf %265 : vector<3x17xf32> to vector<3x17xbf16>
    %cst_52 = arith.constant dense<0.000000e+00> : vector<3x51xf32>
    %268 = tpu.matmul %267, %3, %cst_52 {dimension_numbers = #tpu.dot_dimension_numbers<[1], [0], [0], [1], [0, 0, 1, 1], [], []>} : vector<3x17xbf16>, vector<17x51xbf16>, vector<3x51xf32> -> vector<3x51xf32>
    %269 = vector.extract_strided_slice %266 {offsets = [0, 0], sizes = [3, 17], strides = [1, 1]} : vector<3x51xf32> to vector<3x17xf32>
    %270 = vector.extract_strided_slice %268 {offsets = [0, 0], sizes = [3, 17], strides = [1, 1]} : vector<3x51xf32> to vector<3x17xf32>
    %271 = arith.addf %269, %270 : vector<3x17xf32>
    %272 = arith.negf %271 : vector<3x17xf32>
    %273 = math.exp %272 : vector<3x17xf32>
    %cst_53 = arith.constant 1.000000e+00 : f32
    %274 = vector.broadcast %cst_53 : f32 to vector<3x17xf32>
    %275 = arith.addf %274, %273 : vector<3x17xf32>
    %276 = arith.divf %274, %275 : vector<3x17xf32>
    %277 = vector.extract_strided_slice %266 {offsets = [0, 17], sizes = [3, 17], strides = [1, 1]} : vector<3x51xf32> to vector<3x17xf32>
    %278 = vector.extract_strided_slice %268 {offsets = [0, 17], sizes = [3, 17], strides = [1, 1]} : vector<3x51xf32> to vector<3x17xf32>
    %279 = arith.addf %277, %278 : vector<3x17xf32>
    %280 = arith.negf %279 : vector<3x17xf32>
    %281 = math.exp %280 : vector<3x17xf32>
    %cst_54 = arith.constant 1.000000e+00 : f32
    %282 = vector.broadcast %cst_54 : f32 to vector<3x17xf32>
    %283 = arith.addf %282, %281 : vector<3x17xf32>
    %284 = arith.divf %282, %283 : vector<3x17xf32>
    %285 = vector.extract_strided_slice %266 {offsets = [0, 34], sizes = [3, 17], strides = [1, 1]} : vector<3x51xf32> to vector<3x17xf32>
    %286 = vector.extract_strided_slice %268 {offsets = [0, 34], sizes = [3, 17], strides = [1, 1]} : vector<3x51xf32> to vector<3x17xf32>
    %287 = arith.addf %286, %15 : vector<3x17xf32>
    %288 = arith.mulf %276, %287 : vector<3x17xf32>
    %289 = arith.addf %285, %288 : vector<3x17xf32>
    %290 = math.tanh %289 : vector<3x17xf32>
    %cst_55 = arith.constant 1.000000e+00 : f32
    %291 = vector.broadcast %cst_55 : f32 to vector<3x17xf32>
    %292 = arith.subf %291, %284 : vector<3x17xf32>
    %293 = arith.mulf %292, %290 : vector<3x17xf32>
    %294 = arith.mulf %284, %265 : vector<3x17xf32>
    %295 = arith.addf %293, %294 : vector<3x17xf32>
    %c0_56 = arith.constant 0 : index
    %c0_57 = arith.constant 0 : index
    %c0_58 = arith.constant 0 : index
    %296 = vector.load %arg9[%c0_56, %c0_57, %c0_58] : memref<8x3x17xf32, #tpu.memory_space<vmem>>, vector<1x3x17xf32>
    %297 = vector.shape_cast %296 : vector<1x3x17xf32> to vector<3x17xf32>
    %298 = vector.shape_cast %295 : vector<3x17xf32> to vector<1x3x17xf32>
    tpu.vector_store %arg9[%c0_56, %c0_57, %c0_58], %298 {strides = array<i32>} : memref<8x3x17xf32, #tpu.memory_space<vmem>>, vector<1x3x17xf32>,
    %299 = vector.extract_strided_slice %264 {offsets = [3, 0], sizes = [3, 51], strides = [1, 1]} : vector<24x51xf32> to vector<3x51xf32>
    %300 = arith.truncf %295 : vector<3x17xf32> to vector<3x17xbf16>
    %cst_59 = arith.constant dense<0.000000e+00> : vector<3x51xf32>
    %301 = tpu.matmul %300, %3, %cst_59 {dimension_numbers = #tpu.dot_dimension_numbers<[1], [0], [0], [1], [0, 0, 1, 1], [], []>} : vector<3x17xbf16>, vector<17x51xbf16>, vector<3x51xf32> -> vector<3x51xf32>
    %302 = vector.extract_strided_slice %299 {offsets = [0, 0], sizes = [3, 17], strides = [1, 1]} : vector<3x51xf32> to vector<3x17xf32>
    %303 = vector.extract_strided_slice %301 {offsets = [0, 0], sizes = [3, 17], strides = [1, 1]} : vector<3x51xf32> to vector<3x17xf32>
    %304 = arith.addf %302, %303 : vector<3x17xf32>
    %305 = arith.negf %304 : vector<3x17xf32>
    %306 = math.exp %305 : vector<3x17xf32>
    %cst_60 = arith.constant 1.000000e+00 : f32
    %307 = vector.broadcast %cst_60 : f32 to vector<3x17xf32>
    %308 = arith.addf %307, %306 : vector<3x17xf32>
    %309 = arith.divf %307, %308 : vector<3x17xf32>
    %310 = vector.extract_strided_slice %299 {offsets = [0, 17], sizes = [3, 17], strides = [1, 1]} : vector<3x51xf32> to vector<3x17xf32>
    %311 = vector.extract_strided_slice %301 {offsets = [0, 17], sizes = [3, 17], strides = [1, 1]} : vector<3x51xf32> to vector<3x17xf32>
    %312 = arith.addf %310, %311 : vector<3x17xf32>
    %313 = arith.negf %312 : vector<3x17xf32>
    %314 = math.exp %313 : vector<3x17xf32>
    %cst_61 = arith.constant 1.000000e+00 : f32
    %315 = vector.broadcast %cst_61 : f32 to vector<3x17xf32>
    %316 = arith.addf %315, %314 : vector<3x17xf32>
    %317 = arith.divf %315, %316 : vector<3x17xf32>
    %318 = vector.extract_strided_slice %299 {offsets = [0, 34], sizes = [3, 17], strides = [1, 1]} : vector<3x51xf32> to vector<3x17xf32>
    %319 = vector.extract_strided_slice %301 {offsets = [0, 34], sizes = [3, 17], strides = [1, 1]} : vector<3x51xf32> to vector<3x17xf32>
    %320 = arith.addf %319, %15 : vector<3x17xf32>
    %321 = arith.mulf %309, %320 : vector<3x17xf32>
    %322 = arith.addf %318, %321 : vector<3x17xf32>
    %323 = math.tanh %322 : vector<3x17xf32>
    %cst_62 = arith.constant 1.000000e+00 : f32
    %324 = vector.broadcast %cst_62 : f32 to vector<3x17xf32>
    %325 = arith.subf %324, %317 : vector<3x17xf32>
    %326 = arith.mulf %325, %323 : vector<3x17xf32>
    %327 = arith.mulf %317, %295 : vector<3x17xf32>
    %328 = arith.addf %326, %327 : vector<3x17xf32>
    %c1 = arith.constant 1 : index
    %c0_63 = arith.constant 0 : index
    %c0_64 = arith.constant 0 : index
    %329 = vector.load %arg9[%c1, %c0_63, %c0_64] : memref<8x3x17xf32, #tpu.memory_space<vmem>>, vector<1x3x17xf32>
    %330 = vector.shape_cast %329 : vector<1x3x17xf32> to vector<3x17xf32>
    %331 = vector.shape_cast %328 : vector<3x17xf32> to vector<1x3x17xf32>
    tpu.vector_store %arg9[%c1, %c0_63, %c0_64], %331 {strides = array<i32>} : memref<8x3x17xf32, #tpu.memory_space<vmem>>, vector<1x3x17xf32>,
    %332 = vector.extract_strided_slice %264 {offsets = [6, 0], sizes = [3, 51], strides = [1, 1]} : vector<24x51xf32> to vector<3x51xf32>
    %333 = arith.truncf %328 : vector<3x17xf32> to vector<3x17xbf16>
    %cst_65 = arith.constant dense<0.000000e+00> : vector<3x51xf32>
    %334 = tpu.matmul %333, %3, %cst_65 {dimension_numbers = #tpu.dot_dimension_numbers<[1], [0], [0], [1], [0, 0, 1, 1], [], []>} : vector<3x17xbf16>, vector<17x51xbf16>, vector<3x51xf32> -> vector<3x51xf32>
    %335 = vector.extract_strided_slice %332 {offsets = [0, 0], sizes = [3, 17], strides = [1, 1]} : vector<3x51xf32> to vector<3x17xf32>
    %336 = vector.extract_strided_slice %334 {offsets = [0, 0], sizes = [3, 17], strides = [1, 1]} : vector<3x51xf32> to vector<3x17xf32>
    %337 = arith.addf %335, %336 : vector<3x17xf32>
    %338 = arith.negf %337 : vector<3x17xf32>
    %339 = math.exp %338 : vector<3x17xf32>
    %cst_66 = arith.constant 1.000000e+00 : f32
    %340 = vector.broadcast %cst_66 : f32 to vector<3x17xf32>
    %341 = arith.addf %340, %339 : vector<3x17xf32>
    %342 = arith.divf %340, %341 : vector<3x17xf32>
    %343 = vector.extract_strided_slice %332 {offsets = [0, 17], sizes = [3, 17], strides = [1, 1]} : vector<3x51xf32> to vector<3x17xf32>
    %344 = vector.extract_strided_slice %334 {offsets = [0, 17], sizes = [3, 17], strides = [1, 1]} : vector<3x51xf32> to vector<3x17xf32>
    %345 = arith.addf %343, %344 : vector<3x17xf32>
    %346 = arith.negf %345 : vector<3x17xf32>
    %347 = math.exp %346 : vector<3x17xf32>
    %cst_67 = arith.constant 1.000000e+00 : f32
    %348 = vector.broadcast %cst_67 : f32 to vector<3x17xf32>
    %349 = arith.addf %348, %347 : vector<3x17xf32>
    %350 = arith.divf %348, %349 : vector<3x17xf32>
    %351 = vector.extract_strided_slice %332 {offsets = [0, 34], sizes = [3, 17], strides = [1, 1]} : vector<3x51xf32> to vector<3x17xf32>
    %352 = vector.extract_strided_slice %334 {offsets = [0, 34], sizes = [3, 17], strides = [1, 1]} : vector<3x51xf32> to vector<3x17xf32>
    %353 = arith.addf %352, %15 : vector<3x17xf32>
    %354 = arith.mulf %342, %353 : vector<3x17xf32>
    %355 = arith.addf %351, %354 : vector<3x17xf32>
    %356 = math.tanh %355 : vector<3x17xf32>
    %cst_68 = arith.constant 1.000000e+00 : f32
    %357 = vector.broadcast %cst_68 : f32 to vector<3x17xf32>
    %358 = arith.subf %357, %350 : vector<3x17xf32>
    %359 = arith.mulf %358, %356 : vector<3x17xf32>
    %360 = arith.mulf %350, %328 : vector<3x17xf32>
    %361 = arith.addf %359, %360 : vector<3x17xf32>
    %c2 = arith.constant 2 : index
    %c0_69 = arith.constant 0 : index
    %c0_70 = arith.constant 0 : index
    %362 = vector.load %arg9[%c2, %c0_69, %c0_70] : memref<8x3x17xf32, #tpu.memory_space<vmem>>, vector<1x3x17xf32>
    %363 = vector.shape_cast %362 : vector<1x3x17xf32> to vector<3x17xf32>
    %364 = vector.shape_cast %361 : vector<3x17xf32> to vector<1x3x17xf32>
    tpu.vector_store %arg9[%c2, %c0_69, %c0_70], %364 {strides = array<i32>} : memref<8x3x17xf32, #tpu.memory_space<vmem>>, vector<1x3x17xf32>,
    %365 = vector.extract_strided_slice %264 {offsets = [9, 0], sizes = [3, 51], strides = [1, 1]} : vector<24x51xf32> to vector<3x51xf32>
    %366 = arith.truncf %361 : vector<3x17xf32> to vector<3x17xbf16>
    %cst_71 = arith.constant dense<0.000000e+00> : vector<3x51xf32>
    %367 = tpu.matmul %366, %3, %cst_71 {dimension_numbers = #tpu.dot_dimension_numbers<[1], [0], [0], [1], [0, 0, 1, 1], [], []>} : vector<3x17xbf16>, vector<17x51xbf16>, vector<3x51xf32> -> vector<3x51xf32>
    %368 = vector.extract_strided_slice %365 {offsets = [0, 0], sizes = [3, 17], strides = [1, 1]} : vector<3x51xf32> to vector<3x17xf32>
    %369 = vector.extract_strided_slice %367 {offsets = [0, 0], sizes = [3, 17], strides = [1, 1]} : vector<3x51xf32> to vector<3x17xf32>
    %370 = arith.addf %368, %369 : vector<3x17xf32>
    %371 = arith.negf %370 : vector<3x17xf32>
    %372 = math.exp %371 : vector<3x17xf32>
    %cst_72 = arith.constant 1.000000e+00 : f32
    %373 = vector.broadcast %cst_72 : f32 to vector<3x17xf32>
    %374 = arith.addf %373, %372 : vector<3x17xf32>
    %375 = arith.divf %373, %374 : vector<3x17xf32>
    %376 = vector.extract_strided_slice %365 {offsets = [0, 17], sizes = [3, 17], strides = [1, 1]} : vector<3x51xf32> to vector<3x17xf32>
    %377 = vector.extract_strided_slice %367 {offsets = [0, 17], sizes = [3, 17], strides = [1, 1]} : vector<3x51xf32> to vector<3x17xf32>
    %378 = arith.addf %376, %377 : vector<3x17xf32>
    %379 = arith.negf %378 : vector<3x17xf32>
    %380 = math.exp %379 : vector<3x17xf32>
    %cst_73 = arith.constant 1.000000e+00 : f32
    %381 = vector.broadcast %cst_73 : f32 to vector<3x17xf32>
    %382 = arith.addf %381, %380 : vector<3x17xf32>
    %383 = arith.divf %381, %382 : vector<3x17xf32>
    %384 = vector.extract_strided_slice %365 {offsets = [0, 34], sizes = [3, 17], strides = [1, 1]} : vector<3x51xf32> to vector<3x17xf32>
    %385 = vector.extract_strided_slice %367 {offsets = [0, 34], sizes = [3, 17], strides = [1, 1]} : vector<3x51xf32> to vector<3x17xf32>
    %386 = arith.addf %385, %15 : vector<3x17xf32>
    %387 = arith.mulf %375, %386 : vector<3x17xf32>
    %388 = arith.addf %384, %387 : vector<3x17xf32>
    %389 = math.tanh %388 : vector<3x17xf32>
    %cst_74 = arith.constant 1.000000e+00 : f32
    %390 = vector.broadcast %cst_74 : f32 to vector<3x17xf32>
    %391 = arith.subf %390, %383 : vector<3x17xf32>
    %392 = arith.mulf %391, %389 : vector<3x17xf32>
    %393 = arith.mulf %383, %361 : vector<3x17xf32>
    %394 = arith.addf %392, %393 : vector<3x17xf32>
    %c3 = arith.constant 3 : index
    %c0_75 = arith.constant 0 : index
    %c0_76 = arith.constant 0 : index
    %395 = vector.load %arg9[%c3, %c0_75, %c0_76] : memref<8x3x17xf32, #tpu.memory_space<vmem>>, vector<1x3x17xf32>
    %396 = vector.shape_cast %395 : vector<1x3x17xf32> to vector<3x17xf32>
    %397 = vector.shape_cast %394 : vector<3x17xf32> to vector<1x3x17xf32>
    tpu.vector_store %arg9[%c3, %c0_75, %c0_76], %397 {strides = array<i32>} : memref<8x3x17xf32, #tpu.memory_space<vmem>>, vector<1x3x17xf32>,
    %398 = vector.extract_strided_slice %264 {offsets = [12, 0], sizes = [3, 51], strides = [1, 1]} : vector<24x51xf32> to vector<3x51xf32>
    %399 = arith.truncf %394 : vector<3x17xf32> to vector<3x17xbf16>
    %cst_77 = arith.constant dense<0.000000e+00> : vector<3x51xf32>
    %400 = tpu.matmul %399, %3, %cst_77 {dimension_numbers = #tpu.dot_dimension_numbers<[1], [0], [0], [1], [0, 0, 1, 1], [], []>} : vector<3x17xbf16>, vector<17x51xbf16>, vector<3x51xf32> -> vector<3x51xf32>
    %401 = vector.extract_strided_slice %398 {offsets = [0, 0], sizes = [3, 17], strides = [1, 1]} : vector<3x51xf32> to vector<3x17xf32>
    %402 = vector.extract_strided_slice %400 {offsets = [0, 0], sizes = [3, 17], strides = [1, 1]} : vector<3x51xf32> to vector<3x17xf32>
    %403 = arith.addf %401, %402 : vector<3x17xf32>
    %404 = arith.negf %403 : vector<3x17xf32>
    %405 = math.exp %404 : vector<3x17xf32>
    %cst_78 = arith.constant 1.000000e+00 : f32
    %406 = vector.broadcast %cst_78 : f32 to vector<3x17xf32>
    %407 = arith.addf %406, %405 : vector<3x17xf32>
    %408 = arith.divf %406, %407 : vector<3x17xf32>
    %409 = vector.extract_strided_slice %398 {offsets = [0, 17], sizes = [3, 17], strides = [1, 1]} : vector<3x51xf32> to vector<3x17xf32>
    %410 = vector.extract_strided_slice %400 {offsets = [0, 17], sizes = [3, 17], strides = [1, 1]} : vector<3x51xf32> to vector<3x17xf32>
    %411 = arith.addf %409, %410 : vector<3x17xf32>
    %412 = arith.negf %411 : vector<3x17xf32>
    %413 = math.exp %412 : vector<3x17xf32>
    %cst_79 = arith.constant 1.000000e+00 : f32
    %414 = vector.broadcast %cst_79 : f32 to vector<3x17xf32>
    %415 = arith.addf %414, %413 : vector<3x17xf32>
    %416 = arith.divf %414, %415 : vector<3x17xf32>
    %417 = vector.extract_strided_slice %398 {offsets = [0, 34], sizes = [3, 17], strides = [1, 1]} : vector<3x51xf32> to vector<3x17xf32>
    %418 = vector.extract_strided_slice %400 {offsets = [0, 34], sizes = [3, 17], strides = [1, 1]} : vector<3x51xf32> to vector<3x17xf32>
    %419 = arith.addf %418, %15 : vector<3x17xf32>
    %420 = arith.mulf %408, %419 : vector<3x17xf32>
    %421 = arith.addf %417, %420 : vector<3x17xf32>
    %422 = math.tanh %421 : vector<3x17xf32>
    %cst_80 = arith.constant 1.000000e+00 : f32
    %423 = vector.broadcast %cst_80 : f32 to vector<3x17xf32>
    %424 = arith.subf %423, %416 : vector<3x17xf32>
    %425 = arith.mulf %424, %422 : vector<3x17xf32>
    %426 = arith.mulf %416, %394 : vector<3x17xf32>
    %427 = arith.addf %425, %426 : vector<3x17xf32>
    %c4 = arith.constant 4 : index
    %c0_81 = arith.constant 0 : index
    %c0_82 = arith.constant 0 : index
    %428 = vector.load %arg9[%c4, %c0_81, %c0_82] : memref<8x3x17xf32, #tpu.memory_space<vmem>>, vector<1x3x17xf32>
    %429 = vector.shape_cast %428 : vector<1x3x17xf32> to vector<3x17xf32>
    %430 = vector.shape_cast %427 : vector<3x17xf32> to vector<1x3x17xf32>
    tpu.vector_store %arg9[%c4, %c0_81, %c0_82], %430 {strides = array<i32>} : memref<8x3x17xf32, #tpu.memory_space<vmem>>, vector<1x3x17xf32>,
    %431 = vector.extract_strided_slice %264 {offsets = [15, 0], sizes = [3, 51], strides = [1, 1]} : vector<24x51xf32> to vector<3x51xf32>
    %432 = arith.truncf %427 : vector<3x17xf32> to vector<3x17xbf16>
    %cst_83 = arith.constant dense<0.000000e+00> : vector<3x51xf32>
    %433 = tpu.matmul %432, %3, %cst_83 {dimension_numbers = #tpu.dot_dimension_numbers<[1], [0], [0], [1], [0, 0, 1, 1], [], []>} : vector<3x17xbf16>, vector<17x51xbf16>, vector<3x51xf32> -> vector<3x51xf32>
    %434 = vector.extract_strided_slice %431 {offsets = [0, 0], sizes = [3, 17], strides = [1, 1]} : vector<3x51xf32> to vector<3x17xf32>
    %435 = vector.extract_strided_slice %433 {offsets = [0, 0], sizes = [3, 17], strides = [1, 1]} : vector<3x51xf32> to vector<3x17xf32>
    %436 = arith.addf %434, %435 : vector<3x17xf32>
    %437 = arith.negf %436 : vector<3x17xf32>
    %438 = math.exp %437 : vector<3x17xf32>
    %cst_84 = arith.constant 1.000000e+00 : f32
    %439 = vector.broadcast %cst_84 : f32 to vector<3x17xf32>
    %440 = arith.addf %439, %438 : vector<3x17xf32>
    %441 = arith.divf %439, %440 : vector<3x17xf32>
    %442 = vector.extract_strided_slice %431 {offsets = [0, 17], sizes = [3, 17], strides = [1, 1]} : vector<3x51xf32> to vector<3x17xf32>
    %443 = vector.extract_strided_slice %433 {offsets = [0, 17], sizes = [3, 17], strides = [1, 1]} : vector<3x51xf32> to vector<3x17xf32>
    %444 = arith.addf %442, %443 : vector<3x17xf32>
    %445 = arith.negf %444 : vector<3x17xf32>
    %446 = math.exp %445 : vector<3x17xf32>
    %cst_85 = arith.constant 1.000000e+00 : f32
    %447 = vector.broadcast %cst_85 : f32 to vector<3x17xf32>
    %448 = arith.addf %447, %446 : vector<3x17xf32>
    %449 = arith.divf %447, %448 : vector<3x17xf32>
    %450 = vector.extract_strided_slice %431 {offsets = [0, 34], sizes = [3, 17], strides = [1, 1]} : vector<3x51xf32> to vector<3x17xf32>
    %451 = vector.extract_strided_slice %433 {offsets = [0, 34], sizes = [3, 17], strides = [1, 1]} : vector<3x51xf32> to vector<3x17xf32>
    %452 = arith.addf %451, %15 : vector<3x17xf32>
    %453 = arith.mulf %441, %452 : vector<3x17xf32>
    %454 = arith.addf %450, %453 : vector<3x17xf32>
    %455 = math.tanh %454 : vector<3x17xf32>
    %cst_86 = arith.constant 1.000000e+00 : f32
    %456 = vector.broadcast %cst_86 : f32 to vector<3x17xf32>
    %457 = arith.subf %456, %449 : vector<3x17xf32>
    %458 = arith.mulf %457, %455 : vector<3x17xf32>
    %459 = arith.mulf %449, %427 : vector<3x17xf32>
    %460 = arith.addf %458, %459 : vector<3x17xf32>
    %c5 = arith.constant 5 : index
    %c0_87 = arith.constant 0 : index
    %c0_88 = arith.constant 0 : index
    %461 = vector.load %arg9[%c5, %c0_87, %c0_88] : memref<8x3x17xf32, #tpu.memory_space<vmem>>, vector<1x3x17xf32>
    %462 = vector.shape_cast %461 : vector<1x3x17xf32> to vector<3x17xf32>
    %463 = vector.shape_cast %460 : vector<3x17xf32> to vector<1x3x17xf32>
    tpu.vector_store %arg9[%c5, %c0_87, %c0_88], %463 {strides = array<i32>} : memref<8x3x17xf32, #tpu.memory_space<vmem>>, vector<1x3x17xf32>,
    %464 = vector.extract_strided_slice %264 {offsets = [18, 0], sizes = [3, 51], strides = [1, 1]} : vector<24x51xf32> to vector<3x51xf32>
    %465 = arith.truncf %460 : vector<3x17xf32> to vector<3x17xbf16>
    %cst_89 = arith.constant dense<0.000000e+00> : vector<3x51xf32>
    %466 = tpu.matmul %465, %3, %cst_89 {dimension_numbers = #tpu.dot_dimension_numbers<[1], [0], [0], [1], [0, 0, 1, 1], [], []>} : vector<3x17xbf16>, vector<17x51xbf16>, vector<3x51xf32> -> vector<3x51xf32>
    %467 = vector.extract_strided_slice %464 {offsets = [0, 0], sizes = [3, 17], strides = [1, 1]} : vector<3x51xf32> to vector<3x17xf32>
    %468 = vector.extract_strided_slice %466 {offsets = [0, 0], sizes = [3, 17], strides = [1, 1]} : vector<3x51xf32> to vector<3x17xf32>
    %469 = arith.addf %467, %468 : vector<3x17xf32>
    %470 = arith.negf %469 : vector<3x17xf32>
    %471 = math.exp %470 : vector<3x17xf32>
    %cst_90 = arith.constant 1.000000e+00 : f32
    %472 = vector.broadcast %cst_90 : f32 to vector<3x17xf32>
    %473 = arith.addf %472, %471 : vector<3x17xf32>
    %474 = arith.divf %472, %473 : vector<3x17xf32>
    %475 = vector.extract_strided_slice %464 {offsets = [0, 17], sizes = [3, 17], strides = [1, 1]} : vector<3x51xf32> to vector<3x17xf32>
    %476 = vector.extract_strided_slice %466 {offsets = [0, 17], sizes = [3, 17], strides = [1, 1]} : vector<3x51xf32> to vector<3x17xf32>
    %477 = arith.addf %475, %476 : vector<3x17xf32>
    %478 = arith.negf %477 : vector<3x17xf32>
    %479 = math.exp %478 : vector<3x17xf32>
    %cst_91 = arith.constant 1.000000e+00 : f32
    %480 = vector.broadcast %cst_91 : f32 to vector<3x17xf32>
    %481 = arith.addf %480, %479 : vector<3x17xf32>
    %482 = arith.divf %480, %481 : vector<3x17xf32>
    %483 = vector.extract_strided_slice %464 {offsets = [0, 34], sizes = [3, 17], strides = [1, 1]} : vector<3x51xf32> to vector<3x17xf32>
    %484 = vector.extract_strided_slice %466 {offsets = [0, 34], sizes = [3, 17], strides = [1, 1]} : vector<3x51xf32> to vector<3x17xf32>
    %485 = arith.addf %484, %15 : vector<3x17xf32>
    %486 = arith.mulf %474, %485 : vector<3x17xf32>
    %487 = arith.addf %483, %486 : vector<3x17xf32>
    %488 = math.tanh %487 : vector<3x17xf32>
    %cst_92 = arith.constant 1.000000e+00 : f32
    %489 = vector.broadcast %cst_92 : f32 to vector<3x17xf32>
    %490 = arith.subf %489, %482 : vector<3x17xf32>
    %491 = arith.mulf %490, %488 : vector<3x17xf32>
    %492 = arith.mulf %482, %460 : vector<3x17xf32>
    %493 = arith.addf %491, %492 : vector<3x17xf32>
    %c6 = arith.constant 6 : index
    %c0_93 = arith.constant 0 : index
    %c0_94 = arith.constant 0 : index
    %494 = vector.load %arg9[%c6, %c0_93, %c0_94] : memref<8x3x17xf32, #tpu.memory_space<vmem>>, vector<1x3x17xf32>
    %495 = vector.shape_cast %494 : vector<1x3x17xf32> to vector<3x17xf32>
    %496 = vector.shape_cast %493 : vector<3x17xf32> to vector<1x3x17xf32>
    tpu.vector_store %arg9[%c6, %c0_93, %c0_94], %496 {strides = array<i32>} : memref<8x3x17xf32, #tpu.memory_space<vmem>>, vector<1x3x17xf32>,
    %497 = vector.extract_strided_slice %264 {offsets = [21, 0], sizes = [3, 51], strides = [1, 1]} : vector<24x51xf32> to vector<3x51xf32>
    %498 = arith.truncf %493 : vector<3x17xf32> to vector<3x17xbf16>
    %cst_95 = arith.constant dense<0.000000e+00> : vector<3x51xf32>
    %499 = tpu.matmul %498, %3, %cst_95 {dimension_numbers = #tpu.dot_dimension_numbers<[1], [0], [0], [1], [0, 0, 1, 1], [], []>} : vector<3x17xbf16>, vector<17x51xbf16>, vector<3x51xf32> -> vector<3x51xf32>
    %500 = vector.extract_strided_slice %497 {offsets = [0, 0], sizes = [3, 17], strides = [1, 1]} : vector<3x51xf32> to vector<3x17xf32>
    %501 = vector.extract_strided_slice %499 {offsets = [0, 0], sizes = [3, 17], strides = [1, 1]} : vector<3x51xf32> to vector<3x17xf32>
    %502 = arith.addf %500, %501 : vector<3x17xf32>
    %503 = arith.negf %502 : vector<3x17xf32>
    %504 = math.exp %503 : vector<3x17xf32>
    %cst_96 = arith.constant 1.000000e+00 : f32
    %505 = vector.broadcast %cst_96 : f32 to vector<3x17xf32>
    %506 = arith.addf %505, %504 : vector<3x17xf32>
    %507 = arith.divf %505, %506 : vector<3x17xf32>
    %508 = vector.extract_strided_slice %497 {offsets = [0, 17], sizes = [3, 17], strides = [1, 1]} : vector<3x51xf32> to vector<3x17xf32>
    %509 = vector.extract_strided_slice %499 {offsets = [0, 17], sizes = [3, 17], strides = [1, 1]} : vector<3x51xf32> to vector<3x17xf32>
    %510 = arith.addf %508, %509 : vector<3x17xf32>
    %511 = arith.negf %510 : vector<3x17xf32>
    %512 = math.exp %511 : vector<3x17xf32>
    %cst_97 = arith.constant 1.000000e+00 : f32
    %513 = vector.broadcast %cst_97 : f32 to vector<3x17xf32>
    %514 = arith.addf %513, %512 : vector<3x17xf32>
    %515 = arith.divf %513, %514 : vector<3x17xf32>
    %516 = vector.extract_strided_slice %497 {offsets = [0, 34], sizes = [3, 17], strides = [1, 1]} : vector<3x51xf32> to vector<3x17xf32>
    %517 = vector.extract_strided_slice %499 {offsets = [0, 34], sizes = [3, 17], strides = [1, 1]} : vector<3x51xf32> to vector<3x17xf32>
    %518 = arith.addf %517, %15 : vector<3x17xf32>
    %519 = arith.mulf %507, %518 : vector<3x17xf32>
    %520 = arith.addf %516, %519 : vector<3x17xf32>
    %521 = math.tanh %520 : vector<3x17xf32>
    %cst_98 = arith.constant 1.000000e+00 : f32
    %522 = vector.broadcast %cst_98 : f32 to vector<3x17xf32>
    %523 = arith.subf %522, %515 : vector<3x17xf32>
    %524 = arith.mulf %523, %521 : vector<3x17xf32>
    %525 = arith.mulf %515, %493 : vector<3x17xf32>
    %526 = arith.addf %524, %525 : vector<3x17xf32>
    %c7 = arith.constant 7 : index
    %c0_99 = arith.constant 0 : index
    %c0_100 = arith.constant 0 : index
    %527 = vector.load %arg9[%c7, %c0_99, %c0_100] : memref<8x3x17xf32, #tpu.memory_space<vmem>>, vector<1x3x17xf32>
    %528 = vector.shape_cast %527 : vector<1x3x17xf32> to vector<3x17xf32>
    %529 = vector.shape_cast %526 : vector<3x17xf32> to vector<1x3x17xf32>
    tpu.vector_store %arg9[%c7, %c0_99, %c0_100], %529 {strides = array<i32>} : memref<8x3x17xf32, #tpu.memory_space<vmem>>, vector<1x3x17xf32>,
    %c0_101 = arith.constant 0 : index
    %c0_102 = arith.constant 0 : index
    %c0_103 = arith.constant 0 : index
    %530 = vector.load %arg10[%c0_101, %c0_102, %c0_103] : memref<2x3x17xf32, #tpu.memory_space<vmem>>, vector<1x3x17xf32>
    %531 = vector.shape_cast %530 : vector<1x3x17xf32> to vector<3x17xf32>
    %532 = vector.shape_cast %260 : vector<3x17xf32> to vector<1x3x17xf32>
    tpu.vector_store %arg10[%c0_101, %c0_102, %c0_103], %532 {strides = array<i32>} : memref<2x3x17xf32, #tpu.memory_space<vmem>>, vector<1x3x17xf32>,
    %c1_104 = arith.constant 1 : index
    %c0_105 = arith.constant 0 : index
    %c0_106 = arith.constant 0 : index
    %533 = vector.load %arg10[%c1_104, %c0_105, %c0_106] : memref<2x3x17xf32, #tpu.memory_space<vmem>>, vector<1x3x17xf32>
    %534 = vector.shape_cast %533 : vector<1x3x17xf32> to vector<3x17xf32>
    %535 = vector.shape_cast %526 : vector<3x17xf32> to vector<1x3x17xf32>
    tpu.vector_store %arg10[%c1_104, %c0_105, %c0_106], %535 {strides = array<i32>} : memref<2x3x17xf32, #tpu.memory_space<vmem>>, vector<1x3x17xf32>,
    return
  }
}

</mosaic_0001>

<bundles_post_ra>
// kernel: rnn_forward.1
= control target key start
LH: loop header
LB: loop body
LE: loop exit
PB: predicated region body
PF: predicated region fallthrough
CT: control target
= control target key end

     0   :  { %vm97_vm0 = vcmask 1044480   ;;  %vm162_vm1 = vcmask 1040384   ;;  %v2154_v0 = vmov 0.0   ;;  %v2155_v2 = vmov 0   ;;  %s2157_s27 = smov 34   ;;  %s2158_s28 = smov 94   ;;  %s2685_s1 = inlined_call_operand.vmem [shape: bf16[26,51], index: 1, kind: input, shape index: {}]   ;;  %s2686_s3 = inlined_call_operand.vmem [shape: bf16[17,51], index: 3, kind: input, shape index: {}]   ;;  %s2687_s0 = inlined_call_operand.vmem [shape: f32[24,26], index: 0, kind: input, shape index: {}]   ;;  %s2688_s4 = inlined_call_operand.vmem [shape: f32[1,17], index: 4, kind: input, shape index: {}]   ;;  %s2689_s2 = inlined_call_operand.vmem [shape: f32[1,51], index: 2, kind: input, shape index: {}]   ;;  %s2690_s7 = inlined_call_operand.vmem [shape: bf16[17,51], index: 7, kind: input, shape index: {}]   ;;  %s2691_s5 = inlined_call_operand.vmem [shape: bf16[17,51], index: 5, kind: input, shape index: {}]   ;;  %s2692_s8 = inlined_call_operand.vmem [shape: f32[1,17], index: 8, kind: input, shape index: {}]   ;;  %s2693_s6 = inlined_call_operand.vmem [shape: f32[1,51], index: 6, kind: input, shape index: {}]   ;;  %s2694_s9 = inlined_call_operand.vmem [shape: f32[8,3,17], index: 9, kind: output, shape index: {0}]   ;;  %s2695_s10 = inlined_call_operand.vmem [shape: f32[2,3,17], index: 10, kind: output, shape index: {1}]  }
   0x1   :  { %1883 = vmatprep.subr.bf16.mxu1 %v2154_v0  ;;  %v2026_v1 = vld [vmem:[%s2685_s1] sm:$0xff]   ;;  %v2221_v3 = vsel %vm162_vm1, 65535, %v2155_v2  ;;  %v2028_v5 = vld [vmem:[%s2685_s1 + $0x8] sm:$0x1f]   ;;  %vm2156_vm2 = vmmov 0   ;;  %v76_v10 = vld [vmem:[%s2687_s0 + $0x10] sm:$0xff] }
   0x2   :  { %v2226_v4 = vld [vmem:[%s2686_s3] sm:$0xff]   ;;  %1875 = vmatprep.subr.bf16.mxu0 %v2026_v1  ;;  %1887 = vmatprep.mubr.msk.bf16.mxu1 %vm2156_vm2, %v2154_v0  ;;  %v2029_v6 = vld [vmem:[%s2686_s3 + $0x8] ss:$0 sps:$4 sm:$0x11]   ;;  %v99_v8 = vsel %vm97_vm0, %v2028_v5, 0  ;;  %vm90_vm3 = vcmask 211968   ;;  %v78_v14 = vpack.c.bf16 %v76_v10, %v76_v10 }
   0x3   :  { %1884 = vmatpush3.bf16.msra.mxu1 %v2226_v4  ;;  %1876 = vmatpush3.bf16.msra.mxu0 %v2026_v1  ;;  %v74_v7 = vld [vmem:[%s2687_s0] sm:$0xff]  ;;  %v75_v9 = vld [vmem:[%s2687_s0 + $0x8] sm:$0xff]  ;;  %v2253_v12 = vand.u32 %v2029_v6, %v2221_v3  ;;  %vm158_vm4 = vcmask 138240   ;;  %vm508_vm5 = vcmask 1042432   ;;  %vm880_vm6 = vcmask 1045504  }
   0x4   :  { %1885 = vmatprep.subr.bf16.mxu1 %v2154_v0  ;;  %2019 = vmatprep.subr.msk.bf16.mxu0 %vm97_vm0, %v2028_v5  ;;  %v1761_v11 = vld [vmem:[%s2688_s4] ss:$0 sm:$0xff]  ;;  %v77_v13 = vpack.c.bf16 %v75_v9, %v74_v7  ;;  %vm883_vm7 = vcmask 1043456   ;;  %vm885_vm8 = vcmask 1046528   ;;  %vm887_vm9 = vcmask 1041408  }
   0x5   :  { %215 = vrot.lane.b32.xlu0 %v1761_v11, %s2157_s27  ;;  %v1759_v18 = vld [vmem:[%s2689_s2] ss:$0 sm:$0xff]  ;;  %s2159_s2 = smov 111   ;;  %vm1050_vm10 = vcmask 133120   ;;  %vm1257_vm11 = vcmask 138246   ;;  %vm1349_vm12 = vcmask 134145  }
   0x6   :  { %1879 = vmatprep.mubr.msk.bf16.mxu0 %vm90_vm3, %v77_v13  ;;  %vm1556_vm13 = vcmask 138247   ;;  %vm1654_vm14 = vcmask 135170   ;;  %vm1742_vm15 = vcmask 138245  }
   0x7   :  { %1886 = vmatpush3.bf16.msra.mxu1 %v2253_v12  ;;  %1878 = vmatpush3.bf16.msra.mxu0 %v99_v8 }
   0x8   :  { %1891 = vmatprep.subr.bf16.mxu0 %v2154_v0  ;;  %1899 = vmatprep.subr.bf16.mxu1 %v2154_v0 }
   0xa   :  { %1888 = vmatmul.mubr.bf16.vlgmr.msra.gmra.mrb[0].mxu1 %v2155_v2  ;;  %1880 = vmatmul.mubr.msk.bf16.vlgmr.msra.gmra.mrb[0].mxu0 %vm90_vm3, %v78_v14  ;;  %vm1558_vm3 = vcmask 132096  }
   0xb   :  { %1892 = vmatpush3.bf16.msra.mxu0 %v2226_v4  ;;  %1895 = vmatprep.mubr.msk.bf16.mxu0 %vm2156_vm2, %v2154_v0 }
   0xc   :  { %1893 = vmatprep.subr.bf16.mxu0 %v2154_v0  ;;  %1900 = vmatpush3.bf16.msra.mxu1 %v2226_v4 }
   0xd   :  { %1901 = vmatprep.subr.bf16.mxu1 %v2154_v0  ;;  %1903 = vmatprep.mubr.msk.bf16.mxu1 %vm2156_vm2, %v2154_v0 }
   0xf   :  { %1894 = vmatpush3.bf16.msra.mxu0 %v2253_v12 }
  0x10   :  { %1902 = vmatpush3.bf16.msra.mxu1 %v2253_v12  ;;  %1907 = vmatprep.subr.bf16.mxu0 %v2154_v0 }
  0x11   :  { %1915 = vmatprep.subr.bf16.mxu1 %v2154_v0 }
  0x77   :  { %v2272_v15 = vpop.permute.xlu0 %215 }
  0xdd   :  { %v202_v16 = vpop.f32.mrb[0].mxu1  ;;  %v1881_v17 = vpop.f32.mrb[0].mxu0 }
  0xde   :  { %v218_v19 = vadd.f32 %v2272_v15, %v202_v16  ;;  %v2278_v20 = vadd.f32 %v1881_v17, %v1759_v18  ;;  %v1889_v21 = vpop.f32.mrb[1].mxu1  ;;  %v135_v22 = vpop.f32.mrb[1].mxu0 }
  0xdf   :  { %v205_v23 = vpop.f32.mrb[2].mxu1  ;;  %v1882_v24 = vpop.f32.mrb[2].mxu0  ;;  %v2283_v28 = vadd.f32 %v1759_v18, %v135_v22 }
  0xe0   :  { %220 = vrot.lane.b32.xlu0 %v218_v19, %s2158_s28  ;;  %v1890_v25 = vpop.f32.mrb[3].mxu1  ;;  %v138_v26 = vpop.f32.mrb[3].mxu0 }
  0xe1   :  { %v2281_v27 = vadd.f32 %v1759_v18, %v138_v26  ;;  %v208_v29 = vadd.f32 %v202_v16, %v2283_v28 }
  0xe3   :  { %v1769_v30 = vmul.f32 -1.442695, %v208_v29 }
  0xe5   :  { %2034 = vpow2.f32 %v1769_v30 }
  0xef   :  { %v2035_v31 = vpop.eup %2034 }
  0xf0   :  { %v212_v32 = vadd.f32 1.0, %v2035_v31 }
  0xf2   :  { %2036 = vrcp.f32 %v212_v32 }
  0xfc   :  { %v2037_v33 = vpop.eup %2036 }
  0xfd   :  { %v230_v39 = vsub.f32 1.0, %v2037_v33  ;;  %v236_v41 = vmul.f32 0.0, %v2037_v33 }
 0x152   :  { %v221_v34 = vpop.permute.xlu0 %220 }
 0x153   :  { %v223_v35 = vmul.f32 %v2037_v33, %v221_v34 }
 0x155   :  { %225 = vrot.lane.b32.xlu1 %v223_v35, %s2157_s27 }
 0x1c7   :  { %v226_v36 = vpop.permute.xlu1 %225 }
 0x1c8   :  { %v228_v37 = vadd.f32 %v226_v36, %v2283_v28 }
 0x1ca   :  { %2038 = vtanh.f32 %v228_v37 }
 0x1d4   :  { %v2039_v38 = vpop.eup %2038 }
 0x1d5   :  { %232 = vrot.lane.b32.xlu1 %v2039_v38, %s2159_s2 }
 0x247   :  { %v233_v40 = vpop.permute.xlu1 %232 }
 0x248   :  { %v235_v42 = vmul.f32 %v233_v40, %v230_v39 }
 0x24a   :  { %v2289_v43 = vadd.f32 %v236_v41, %v235_v42 }
 0x24c   :  { %v238_v44 = vpack.c.bf16 %v2289_v43, %v2289_v43  ;;  %v315_v1 = vrot.slane %v2289_v43, 5 }
 0x24e   :  { %240 = vrot.lane.b32.xlu0 %v238_v44, %s2159_s2 }
 0x2c0   :  { %v241_v45 = vpop.permute.xlu0 %240 }
 0x2c1   :  { %1896 = vmatmul.mubr.msk.bf16.vlgmr.msra.gmra.mrb[4].mxu0 %vm158_vm4, %v241_v45 }
 0x2c2   :  { %1908 = vmatpush3.bf16.msra.mxu0 %v2226_v4  ;;  %1911 = vmatprep.mubr.msk.bf16.mxu0 %vm2156_vm2, %v2154_v0 }
 0x2c3   :  { %1909 = vmatprep.subr.bf16.mxu0 %v2154_v0 }
 0x2c6   :  { %1910 = vmatpush3.bf16.msra.mxu0 %v2253_v12 }
 0x2c7   :  { %1923 = vmatprep.subr.bf16.mxu0 %v2154_v0 }
 0x394   :  { %v279_v46 = vpop.f32.mrb[4].mxu0 }
 0x395   :  { %v295_v47 = vadd.f32 %v279_v46, %v2272_v15  ;;  %v1897_v48 = vpop.f32.mrb[5].mxu0  ;;  %v286_v52 = vrot.slane %v279_v46, 5 }
 0x396   :  { %v282_v49 = vpop.f32.mrb[6].mxu0 }
 0x397   :  { %v297_v50 = vrot.slane %v295_v47, 5  ;;  %v1898_v51 = vpop.f32.mrb[7].mxu0  ;;  %v288_v53 = vadd.f32 %v286_v52, %v2283_v28 }
 0x399   :  { %298 = vrot.lane.b32.xlu1 %v297_v50, %s2158_s28  ;;  %v1771_v54 = vmul.f32 -1.442695, %v288_v53 }
 0x39b   :  { %2040 = vpow2.f32 %v1771_v54 }
 0x3a5   :  { %v2041_v55 = vpop.eup %2040 }
 0x3a6   :  { %v292_v56 = vadd.f32 1.0, %v2041_v55 }
 0x3a8   :  { %2042 = vrcp.f32 %v292_v56 }
 0x3b2   :  { %v2043_v57 = vpop.eup %2042 }
 0x3b3   :  { %v308_v63 = vsub.f32 1.0, %v2043_v57  ;;  %v317_v6 = vmul.f32 %v2043_v57, %v315_v1 }
 0x40b   :  { %v299_v58 = vpop.permute.xlu1 %298 }
 0x40c   :  { %v301_v59 = vmul.f32 %v2043_v57, %v299_v58 }
 0x40e   :  { %303 = vrot.lane.b32.xlu0 %v301_v59, %s2157_s27 }
 0x480   :  { %v304_v60 = vpop.permute.xlu0 %303 }
 0x481   :  { %v306_v61 = vadd.f32 %v304_v60, %v2283_v28 }
 0x483   :  { %2044 = vtanh.f32 %v306_v61 }
 0x48d   :  { %v2045_v62 = vpop.eup %2044 }
 0x48e   :  { %310 = vrot.lane.b32.xlu1 %v2045_v62, %s2159_s2 }
 0x500   :  { %v311_v5 = vpop.permute.xlu1 %310 }
 0x501   :  { %v313_v7 = vmul.f32 %v311_v5, %v308_v63 }
 0x503   :  { %v2308_v8 = vadd.f32 %v317_v6, %v313_v7 }
 0x505   :  { %v319_v9 = vpack.c.bf16 %v2308_v8, %v2308_v8  ;;  %v423_v49 = vrot.slane %v2308_v8, 5  ;;  %v879_v58 = vsel %vm508_vm5, %v2289_v43, %v2308_v8 }
 0x507   :  { %v321_v10 = vshrl.u32 %v319_v9, 16  ;;  %v324_v11 = vshll.u32 %v319_v9, 16 }
 0x509   :  { %v323_v13 = vrot.slane %v321_v10, 1  ;;  %v326_v14 = vrot.slane %v324_v11, 2 }
 0x50b   :  { %v327_v16 = vor.u32 %v326_v14, %v323_v13 }
 0x50d   :  { %328 = vrot.lane.b32.xlu0 %v327_v16, %s2159_s2 }
 0x57f   :  { %v329_v17 = vpop.permute.xlu0 %328 }
 0x580   :  { %1904 = vmatmul.mubr.msk.bf16.vlgmr.msra.gmra.mrb[4].mxu1 %vm158_vm4, %v329_v17 }
 0x581   :  { %1916 = vmatpush3.bf16.msra.mxu1 %v2226_v4  ;;  %1919 = vmatprep.mubr.msk.bf16.mxu1 %vm2156_vm2, %v2154_v0 }
 0x582   :  { %1917 = vmatprep.subr.bf16.mxu1 %v2154_v0 }
 0x585   :  { %1918 = vmatpush3.bf16.msra.mxu1 %v2253_v12 }
 0x586   :  { %1931 = vmatprep.subr.bf16.mxu1 %v2154_v0 }
 0x653   :  { %v367_v18 = vpop.f32.mrb[4].mxu1 }
 0x654   :  { %v390_v19 = vadd.f32 %v367_v18, %v2272_v15  ;;  %v1905_v21 = vpop.f32.mrb[5].mxu1  ;;  %v374_v25 = vrot.slane %v367_v18, 2 }
 0x655   :  { %v370_v22 = vpop.f32.mrb[6].mxu1 }
 0x656   :  { %v392_v23 = vrot.slane %v390_v19, 2  ;;  %v1906_v24 = vpop.f32.mrb[7].mxu1  ;;  %v376_v26 = vadd.f32 %v374_v25, %v2283_v28  ;;  %v377_v29 = vadd.f32 %v374_v25, %v2281_v27 }
 0x658   :  { %393 = vrot.lane.b32.xlu1 %v392_v23, %s2158_s28  ;;  %v1773_v30 = vmul.f32 -1.442695, %v376_v26  ;;  %v1774_v31 = vmul.f32 -1.442695, %v377_v29 }
 0x65a   :  { %2046 = vpow2.f32 %v1773_v30 }
 0x65b   :  { %2048 = vpow2.f32 %v1774_v31 }
 0x664   :  { %v2047_v32 = vpop.eup %2046 }
 0x665   :  { %v2049_v33 = vpop.eup %2048  ;;  %v384_v34 = vadd.f32 1.0, %v2047_v32 }
 0x666   :  { %v385_v35 = vadd.f32 1.0, %v2049_v33 }
 0x667   :  { %2050 = vrcp.f32 %v384_v34 }
 0x668   :  { %2052 = vrcp.f32 %v385_v35 }
 0x671   :  { %v2051_v36 = vpop.eup %2050 }
 0x672   :  { %v2053_v37 = vpop.eup %2052  ;;  %v410_v51 = vsub.f32 1.0, %v2051_v36  ;;  %v425_v55 = vmul.f32 %v2051_v36, %v423_v49 }
 0x673   :  { %v411_v48 = vsub.f32 1.0, %v2053_v37  ;;  %v426_v52 = vmul.f32 %v2053_v37, %v423_v49 }
 0x6ca   :  { %v394_v38 = vpop.permute.xlu1 %393 }
 0x6cb   :  { %v396_v39 = vmul.f32 %v2051_v36, %v394_v38  ;;  %v397_v40 = vmul.f32 %v2053_v37, %v394_v38 }
 0x6cd   :  { %402 = vrot.lane.b32.xlu1 %v397_v40, %s2157_s27  ;;  %400 = vrot.lane.b32.xlu0 %v396_v39, %s2157_s27 }
 0x73f   :  { %v403_v41 = vpop.permute.xlu1 %402  ;;  %v401_v42 = vpop.permute.xlu0 %400 }
 0x740   :  { %v407_v44 = vadd.f32 %v403_v41, %v2281_v27  ;;  %v406_v45 = vadd.f32 %v401_v42, %v2283_v28 }
 0x742   :  { %2054 = vtanh.f32 %v407_v44 }
 0x743   :  { %2056 = vtanh.f32 %v406_v45 }
 0x74c   :  { %v2055_v46 = vpop.eup %2054 }
 0x74d   :  { %v2057_v47 = vpop.eup %2056  ;;  %416 = vrot.lane.b32.xlu1 %v2055_v46, %s2159_s2 }
 0x74e   :  { %414 = vrot.lane.b32.xlu0 %v2057_v47, %s2159_s2 }
 0x7bf   :  { %v417_v50 = vpop.permute.xlu1 %416 }
 0x7c0   :  { %v421_v53 = vmul.f32 %v417_v50, %v411_v48  ;;  %v415_v54 = vpop.permute.xlu0 %414 }
 0x7c1   :  { %v420_v56 = vmul.f32 %v415_v54, %v410_v51 }
 0x7c2   :  { %v2331_v28 = vadd.f32 %v426_v52, %v421_v53 }
 0x7c3   :  { %v427_v57 = vadd.f32 %v425_v55, %v420_v56 }
 0x7c4   :  { %v510_v22 = vrot.slane %v2331_v28, 5 }
 0x7c5   :  { %v429_v59 = vpack.c.bf16 %v2331_v28, %v427_v57  ;;  %v2337_v60 = vsel %vm880_vm6, %v879_v58, %v427_v57  ;;  %v509_v23 = vrot.slane %v427_v57, 5 }
 0x7c7   :  { %v431_v61 = vrot.slane %v429_v59, 3  ;;  %v511_v25 = vsel %vm508_vm5, %v509_v23, %v510_v22 }
 0x7c9   :  { %432 = vrot.lane.b32.xlu0 %v431_v61, %s2159_s2 }
 0x83b   :  { %v433_v62 = vpop.permute.xlu0 %432 }
 0x83c   :  { %1912 = vmatmul.mubr.msk.bf16.vlgmr.msra.gmra.mrb[8].mxu0 %vm158_vm4, %v433_v62 }
 0x83d   :  { %1924 = vmatpush3.bf16.msra.mxu0 %v2226_v4  ;;  %1927 = vmatprep.mubr.msk.bf16.mxu0 %vm2156_vm2, %v2154_v0 }
 0x83e   :  { %1925 = vmatprep.subr.bf16.mxu0 %v2154_v0 }
 0x841   :  { %1926 = vmatpush3.bf16.msra.mxu0 %v2253_v12 }
 0x842   :  { %1939 = vmatprep.subr.bf16.mxu0 %v2154_v0 }
 0x90f   :  { %v471_v43 = vpop.f32.mrb[8].mxu0 }
 0x910   :  { %v487_v63 = vadd.f32 %v471_v43, %v2272_v15  ;;  %v1913_v1 = vpop.f32.mrb[9].mxu0  ;;  %v478_v8 = vrot.slane %v471_v43, 7 }
 0x911   :  { %v474_v5 = vpop.f32.mrb[10].mxu0 }
 0x912   :  { %v489_v6 = vrot.slane %v487_v63, 7  ;;  %v1914_v7 = vpop.f32.mrb[11].mxu0  ;;  %v480_v9 = vadd.f32 %v478_v8, %v2281_v27 }
 0x914   :  { %490 = vrot.lane.b32.xlu1 %v489_v6, %s2158_s28  ;;  %v1776_v10 = vmul.f32 -1.442695, %v480_v9 }
 0x916   :  { %2058 = vpow2.f32 %v1776_v10 }
 0x920   :  { %v2059_v11 = vpop.eup %2058 }
 0x921   :  { %v484_v13 = vadd.f32 1.0, %v2059_v11 }
 0x923   :  { %2060 = vrcp.f32 %v484_v13 }
 0x92d   :  { %v2061_v14 = vpop.eup %2060 }
 0x92e   :  { %v500_v24 = vsub.f32 1.0, %v2061_v14  ;;  %v513_v29 = vmul.f32 %v2061_v14, %v511_v25 }
 0x986   :  { %v491_v16 = vpop.permute.xlu1 %490 }
 0x987   :  { %v493_v17 = vmul.f32 %v2061_v14, %v491_v16 }
 0x989   :  { %495 = vrot.lane.b32.xlu0 %v493_v17, %s2157_s27 }
 0x9fb   :  { %v496_v18 = vpop.permute.xlu0 %495 }
 0x9fc   :  { %v498_v19 = vadd.f32 %v496_v18, %v2281_v27 }
 0x9fe   :  { %2062 = vtanh.f32 %v498_v19 }
 0xa08   :  { %v2063_v21 = vpop.eup %2062 }
 0xa09   :  { %502 = vrot.lane.b32.xlu1 %v2063_v21, %s2159_s2 }
 0xa7b   :  { %v503_v26 = vpop.permute.xlu1 %502 }
 0xa7c   :  { %v505_v30 = vmul.f32 %v503_v26, %v500_v24 }
 0xa7e   :  { %v514_v31 = vadd.f32 %v513_v29, %v505_v30 }
 0xa80   :  { %v515_v32 = vpack.c.bf16 %v514_v31, %v514_v31  ;;  %v598_v57 = vrot.slane %v514_v31, 5  ;;  %v882_v43 = vsel %vm162_vm1, %v2331_v28, %v514_v31  ;;  %vm1259_vm1 = vcmask 131072  }
 0xa82   :  { %v519_v33 = vshll.u32 %v515_v32, 16  ;;  %v517_v34 = vshrl.u32 %v515_v32, 16 }
 0xa84   :  { %v521_v35 = vrot.slane %v519_v33, 1 }
 0xa86   :  { %v522_v36 = vor.u32 %v521_v35, %v517_v34 }
 0xa88   :  { %523 = vrot.lane.b32.xlu0 %v522_v36, %s2159_s2 }
 0xafa   :  { %v524_v37 = vpop.permute.xlu0 %523 }
 0xafb   :  { %1920 = vmatmul.mubr.msk.bf16.vlgmr.msra.gmra.mrb[8].mxu1 %vm158_vm4, %v524_v37 }
 0xafc   :  { %1932 = vmatpush3.bf16.msra.mxu1 %v2226_v4  ;;  %1935 = vmatprep.mubr.msk.bf16.mxu1 %vm2156_vm2, %v2154_v0 }
 0xafd   :  { %1933 = vmatprep.subr.bf16.mxu1 %v2154_v0 }
 0xb00   :  { %1934 = vmatpush3.bf16.msra.mxu1 %v2253_v12 }
 0xbce   :  { %v562_v38 = vpop.f32.mrb[8].mxu1 }
 0xbcf   :  { %v578_v39 = vadd.f32 %v562_v38, %v2272_v15  ;;  %v1921_v40 = vpop.f32.mrb[9].mxu1  ;;  %v569_v45 = vrot.slane %v562_v38, 4 }
 0xbd0   :  { %v565_v41 = vpop.f32.mrb[10].mxu1 }
 0xbd1   :  { %v580_v42 = vrot.slane %v578_v39, 4  ;;  %v1922_v44 = vpop.f32.mrb[11].mxu1  ;;  %v571_v46 = vadd.f32 %v569_v45, %v2281_v27 }
 0xbd3   :  { %581 = vrot.lane.b32.xlu1 %v580_v42, %s2158_s28  ;;  %v1778_v47 = vmul.f32 -1.442695, %v571_v46 }
 0xbd5   :  { %2064 = vpow2.f32 %v1778_v47 }
 0xbdf   :  { %v2065_v48 = vpop.eup %2064 }
 0xbe0   :  { %v575_v49 = vadd.f32 1.0, %v2065_v48 }
 0xbe2   :  { %2066 = vrcp.f32 %v575_v49 }
 0xbec   :  { %v2067_v50 = vpop.eup %2066 }
 0xbed   :  { %v591_v56 = vsub.f32 1.0, %v2067_v50  ;;  %v600_v59 = vmul.f32 %v2067_v50, %v598_v57 }
 0xc45   :  { %v582_v51 = vpop.permute.xlu1 %581 }
 0xc46   :  { %v584_v52 = vmul.f32 %v2067_v50, %v582_v51 }
 0xc48   :  { %586 = vrot.lane.b32.xlu0 %v584_v52, %s2157_s27 }
 0xcba   :  { %v587_v53 = vpop.permute.xlu0 %586 }
 0xcbb   :  { %v589_v54 = vadd.f32 %v587_v53, %v2281_v27 }
 0xcbd   :  { %2068 = vtanh.f32 %v589_v54 }
 0xcc7   :  { %v2069_v55 = vpop.eup %2068 }
 0xcc8   :  { %593 = vrot.lane.b32.xlu1 %v2069_v55, %s2159_s2 }
 0xd3a   :  { %v594_v58 = vpop.permute.xlu1 %593 }
 0xd3b   :  { %v596_v61 = vmul.f32 %v594_v58, %v591_v56 }
 0xd3d   :  { %v601_v62 = vadd.f32 %v600_v59, %v596_v61 }
 0xd3f   :  { %v884_v63 = vsel %vm883_vm7, %v882_v43, %v601_v62  ;;  %v602_v1 = vpack.c.bf16 %v601_v62, %v601_v62  ;;  %v700_v36 = vrot.slane %v601_v62, 5 }
 0xd41   :  { %v604_v5 = vrot.slane %v602_v1, 2 }
 0xd43   :  { %605 = vrot.lane.b32.xlu0 %v604_v5, %s2159_s2 }
 0xdb5   :  { %v606_v6 = vpop.permute.xlu0 %605 }
 0xdb6   :  { %1928 = vmatmul.mubr.msk.bf16.vlgmr.msra.gmra.mrb[12].mxu0 %vm158_vm4, %v606_v6 }
 0xdb7   :  { %1940 = vmatpush3.bf16.msra.mxu0 %v2226_v4  ;;  %1943 = vmatprep.mubr.msk.bf16.mxu0 %vm2156_vm2, %v2154_v0 }
 0xdb8   :  { %1941 = vmatprep.subr.bf16.mxu0 %v2154_v0 }
 0xdbb   :  { %1942 = vmatpush3.bf16.msra.mxu0 %v2253_v12 }
 0xdbc   :  { %1955 = vmatprep.subr.bf16.mxu0 %v2154_v0 }
 0xe89   :  { %v644_v28 = vpop.f32.mrb[12].mxu0 }
 0xe8a   :  { %v667_v7 = vadd.f32 %v644_v28, %v2272_v15  ;;  %v1929_v8 = vpop.f32.mrb[13].mxu0  ;;  %v651_v13 = vrot.slane %v644_v28, 1 }
 0xe8b   :  { %v647_v9 = vpop.f32.mrb[14].mxu0 }
 0xe8c   :  { %v669_v10 = vrot.slane %v667_v7, 1  ;;  %v1930_v11 = vpop.f32.mrb[15].mxu0  ;;  %v653_v4 = vadd.f32 %v651_v13, %v2281_v27  ;;  %v654_v14 = vadd.f32 %v651_v13, %v2278_v20 }
 0xe8e   :  { %670 = vrot.lane.b32.xlu1 %v669_v10, %s2158_s28  ;;  %v1780_v16 = vmul.f32 -1.442695, %v653_v4  ;;  %v1781_v17 = vmul.f32 -1.442695, %v654_v14 }
 0xe90   :  { %2070 = vpow2.f32 %v1780_v16 }
 0xe91   :  { %2072 = vpow2.f32 %v1781_v17 }
 0xe9a   :  { %v2071_v12 = vpop.eup %2070 }
 0xe9b   :  { %v2073_v18 = vpop.eup %2072  ;;  %v661_v19 = vadd.f32 1.0, %v2071_v12 }
 0xe9c   :  { %v662_v21 = vadd.f32 1.0, %v2073_v18 }
 0xe9d   :  { %2074 = vrcp.f32 %v661_v19 }
 0xe9e   :  { %2076 = vrcp.f32 %v662_v21 }
 0xea7   :  { %v2075_v22 = vpop.eup %2074 }
 0xea8   :  { %v2077_v23 = vpop.eup %2076  ;;  %v687_v38 = vsub.f32 1.0, %v2075_v22  ;;  %v702_v42 = vmul.f32 %v2075_v22, %v700_v36 }
 0xea9   :  { %v688_v35 = vsub.f32 1.0, %v2077_v23  ;;  %v703_v39 = vmul.f32 %v2077_v23, %v700_v36 }
 0xf00   :  { %v671_v24 = vpop.permute.xlu1 %670 }
 0xf01   :  { %v673_v25 = vmul.f32 %v2075_v22, %v671_v24  ;;  %v674_v26 = vmul.f32 %v2077_v23, %v671_v24 }
 0xf03   :  { %679 = vrot.lane.b32.xlu1 %v674_v26, %s2157_s27  ;;  %677 = vrot.lane.b32.xlu0 %v673_v25, %s2157_s27 }
 0xf75   :  { %v680_v29 = vpop.permute.xlu1 %679  ;;  %v678_v30 = vpop.permute.xlu0 %677 }
 0xf76   :  { %v684_v31 = vadd.f32 %v680_v29, %v2278_v20  ;;  %v683_v32 = vadd.f32 %v678_v30, %v2281_v27 }
 0xf78   :  { %2078 = vtanh.f32 %v684_v31 }
 0xf79   :  { %2080 = vtanh.f32 %v683_v32 }
 0xf82   :  { %v2079_v33 = vpop.eup %2078 }
 0xf83   :  { %v2081_v34 = vpop.eup %2080  ;;  %693 = vrot.lane.b32.xlu1 %v2079_v33, %s2159_s2 }
 0xf84   :  { %691 = vrot.lane.b32.xlu0 %v2081_v34, %s2159_s2 }
 0xff5   :  { %v694_v37 = vpop.permute.xlu1 %693 }
 0xff6   :  { %v698_v40 = vmul.f32 %v694_v37, %v688_v35  ;;  %v692_v41 = vpop.permute.xlu0 %691 }
 0xff7   :  { %v697_v44 = vmul.f32 %v692_v41, %v687_v38  ;;  %v2426_v41 = vld [vmem:[%s2690_s7] sm:$0xff]  }
 0xff8   :  { %v2388_v45 = vadd.f32 %v703_v39, %v698_v40 }
 0xff9   :  { %v704_v27 = vadd.f32 %v702_v42, %v697_v44  ;;  %v2031_v42 = vld [vmem:[%s2690_s7 + $0x8] ss:$0 sps:$4 sm:$0x11]  }
 0xffa   :  { %v792_v11 = vrot.slane %v2388_v45, 5  ;;  %v2033_v44 = vld [vmem:[%s2691_s5 + $0x8] ss:$0 sps:$4 sm:$0x11]  }
 0xffb   :  { %v706_v46 = vpack.c.bf16 %v2388_v45, %v704_v27  ;;  %v2391_v47 = vsel %vm885_vm8, %v884_v63, %v704_v27  ;;  %v791_v13 = vrot.slane %v704_v27, 5 }
 0xffc   :  { %v890_v48 = vpack.c.bf16 %v2391_v47, %v2337_v60  ;;  %v2032_v60 = vld [vmem:[%s2691_s5] sm:$0xff]  }
 0xffd   :  { %v708_v49 = vshrl.u32 %v706_v46, 16  ;;  %v711_v50 = vshll.u32 %v706_v46, 16  ;;  %v793_v14 = vsel %vm508_vm5, %v791_v13, %v792_v11  ;;  %1947 = vmatprep.subr.bf16.mxu1 %v2032_v60  ;;  %v914_v46 = vand.u32 %v2033_v44, %v2221_v3 }
 0xfff   :  { %v710_v51 = vrot.slane %v708_v49, 3  ;;  %v713_v52 = vrot.slane %v711_v50, 4 }
0x1001   :  { %v714_v53 = vor.u32 %v713_v52, %v710_v51 }
0x1003   :  { %715 = vrot.lane.b32.xlu0 %v714_v53, %s2159_s2 }
0x1075   :  { %v716_v54 = vpop.permute.xlu0 %715 }
0x1076   :  { %1936 = vmatmul.mubr.msk.bf16.vlgmr.msra.gmra.mrb[12].mxu1 %vm158_vm4, %v716_v54 }
0x1077   :  { %1948 = vmatpush3.bf16.msra.mxu1 %v2032_v60 }
0x1078   :  { %1949 = vmatprep.subr.bf16.mxu1 %v914_v46 }
0x107b   :  { %1950 = vmatpush3.bf16.msra.mxu1 %v914_v46 }
0x107c   :  { %1963 = vmatprep.subr.bf16.mxu1 %v2154_v0 }
0x1149   :  { %v754_v55 = vpop.f32.mrb[12].mxu1 }
0x114a   :  { %v770_v56 = vadd.f32 %v754_v55, %v2272_v15  ;;  %v1937_v57 = vpop.f32.mrb[13].mxu1  ;;  %v761_v62 = vrot.slane %v754_v55, 6 }
0x114b   :  { %v757_v58 = vpop.f32.mrb[14].mxu1 }
0x114c   :  { %v772_v59 = vrot.slane %v770_v56, 6  ;;  %v1938_v61 = vpop.f32.mrb[15].mxu1  ;;  %v763_v43 = vadd.f32 %v761_v62, %v2278_v20 }
0x114e   :  { %773 = vrot.lane.b32.xlu1 %v772_v59, %s2158_s28  ;;  %v1783_v63 = vmul.f32 -1.442695, %v763_v43 }
0x1150   :  { %2082 = vpow2.f32 %v1783_v63 }
0x115a   :  { %v2083_v1 = vpop.eup %2082 }
0x115b   :  { %v767_v5 = vadd.f32 1.0, %v2083_v1 }
0x115d   :  { %2084 = vrcp.f32 %v767_v5 }
0x1167   :  { %v2085_v6 = vpop.eup %2084 }
0x1168   :  { %v783_v4 = vsub.f32 1.0, %v2085_v6  ;;  %v795_v17 = vmul.f32 %v2085_v6, %v793_v14 }
0x11c0   :  { %v774_v28 = vpop.permute.xlu1 %773 }
0x11c1   :  { %v776_v7 = vmul.f32 %v2085_v6, %v774_v28 }
0x11c3   :  { %778 = vrot.lane.b32.xlu0 %v776_v7, %s2157_s27 }
0x1235   :  { %v779_v8 = vpop.permute.xlu0 %778 }
0x1236   :  { %v781_v9 = vadd.f32 %v779_v8, %v2278_v20 }
0x1238   :  { %2086 = vtanh.f32 %v781_v9 }
0x1242   :  { %v2087_v10 = vpop.eup %2086 }
0x1243   :  { %785 = vrot.lane.b32.xlu1 %v2087_v10, %s2159_s2 }
0x12b5   :  { %v786_v16 = vpop.permute.xlu1 %785 }
0x12b6   :  { %v788_v12 = vmul.f32 %v786_v16, %v783_v4 }
0x12b8   :  { %v2405_v18 = vadd.f32 %v795_v17, %v788_v12 }
0x12ba   :  { %v797_v19 = vpack.c.bf16 %v2405_v18, %v2405_v18  ;;  %v875_v47 = vrot.slane %v2405_v18, 5  ;;  %v888_v52 = vsel %vm887_vm9, %v2388_v45, %v2405_v18  ;;  %v1760_v45 = vld [vmem:[%s2693_s6] ss:$0 sm:$0xff] }
0x12bc   :  { %v799_v21 = vrot.slane %v797_v19, 1 }
0x12be   :  { %800 = vrot.lane.b32.xlu0 %v799_v21, %s2159_s2 }
0x1330   :  { %v801_v22 = vpop.permute.xlu0 %800 }
0x1331   :  { %1944 = vmatmul.mubr.msk.bf16.vlgmr.msra.gmra.mrb[16].mxu0 %vm158_vm4, %v801_v22 }
0x1332   :  { %1959 = vmatprep.mubr.msk.bf16.mxu0 %vm2156_vm2, %v2154_v0  ;;  %1956 = vmatpush3.bf16.msra.mxu0 %v2426_v41 }
0x1333   :  { %1957 = vmatprep.subr.bf16.mxu0 %v2154_v0 }
0x1404   :  { %v839_v23 = vpop.f32.mrb[16].mxu0 }
0x1405   :  { %v855_v24 = vadd.f32 %v839_v23, %v2272_v15  ;;  %v1945_v25 = vpop.f32.mrb[17].mxu0  ;;  %v846_v31 = vrot.slane %v839_v23, 3 }
0x1406   :  { %v842_v26 = vpop.f32.mrb[18].mxu0 }
0x1407   :  { %v857_v29 = vrot.slane %v855_v24, 3  ;;  %v1946_v30 = vpop.f32.mrb[19].mxu0  ;;  %v848_v32 = vadd.f32 %v846_v31, %v2278_v20 }
0x1409   :  { %858 = vrot.lane.b32.xlu1 %v857_v29, %s2158_s28  ;;  %v1785_v33 = vmul.f32 -1.442695, %v848_v32 }
0x140b   :  { %2088 = vpow2.f32 %v1785_v33 }
0x1415   :  { %v2089_v34 = vpop.eup %2088 }
0x1416   :  { %v852_v35 = vadd.f32 1.0, %v2089_v34 }
0x1418   :  { %2090 = vrcp.f32 %v852_v35 }
0x1422   :  { %v2091_v36 = vpop.eup %2090 }
0x1423   :  { %v877_v49 = vmul.f32 %v2091_v36, %v875_v47 }
0x147b   :  { %v859_v37 = vpop.permute.xlu1 %858 }
0x147c   :  { %v861_v38 = vmul.f32 %v2091_v36, %v859_v37 }
0x147e   :  { %863 = vrot.lane.b32.xlu0 %v861_v38, %s2157_s27 }
0x1482   :  { %894 = vrot.lane.b32.xlu0 %v890_v48, %s2159_s2 }
0x14f0   :  { %v864_v15 = vpop.permute.xlu0 %863 }
0x14f1   :  { %v866_v39 = vadd.f32 %v864_v15, %v2278_v20  ;;  %v2437_v20 = vand.u32 %v2031_v42, %v2221_v3  ;;  %v1762_v3 = vld [vmem:[%s2692_s8] ss:$0 sm:$0xff] }
0x14f2   :  { %1023 = vrot.lane.b32.xlu0 %v1762_v3, %s2157_s27 }
0x14f3   :  { %2092 = vtanh.f32 %v866_v39  ;;  %1958 = vmatpush3.bf16.msra.mxu0 %v2437_v20 }
0x14f4   :  { %v895_v40 = vpop.permute.xlu0 %894  ;;  %1971 = vmatprep.subr.bf16.mxu0 %v2154_v0 }
0x14f5   :  { %1951 = vmatprep.mubr.msk.bf16.mxu1 %vm158_vm4, %v895_v40 }
0x14f6   :  { %1960 = vmatmul.mubr.bf16.vlgmr.msra.gmra.mrb[20].mxu0 %v2155_v2  ;;  %v868_v2 = vsub.f32 1.0, %v2091_v36 }
0x14f7   :  { %1972 = vmatpush3.bf16.msra.mxu0 %v2426_v41  ;;  %1975 = vmatprep.mubr.msk.bf16.mxu0 %vm2156_vm2, %v2154_v0 }
0x14f8   :  { %1973 = vmatprep.subr.bf16.mxu0 %v2154_v0 }
0x14fb   :  { %1974 = vmatpush3.bf16.msra.mxu0 %v2437_v20 }
0x14fc   :  { %1987 = vmatprep.subr.bf16.mxu0 %v2154_v0 }
0x14fd   :  { %v2093_v27 = vpop.eup %2092 }
0x14fe   :  { %870 = vrot.lane.b32.xlu1 %v2093_v27, %s2159_s2 }
0x1564   :  { %v2466_v59 = vpop.permute.xlu0 %1023 }
0x1570   :  { %v871_v48 = vpop.permute.xlu1 %870 }
0x1571   :  { %v873_v50 = vmul.f32 %v871_v48, %v868_v2 }
0x1573   :  { %v2459_v51 = vadd.f32 %v877_v49, %v873_v50 }
0x1575   :  { %v889_v53 = vsel %vm97_vm0, %v888_v52, %v2459_v51  ;;  %vm1137_vm0 = vcmask 136195  }
0x1576   :  { %v891_v54 = vpack.c.bf16 %v889_v53, %v889_v53 }
0x1578   :  { %896 = vrot.lane.b32.xlu1 %v891_v54, %s2159_s2 }
0x15c9   :  { %v1010_v55 = vpop.f32.mrb[20].mxu0 }
0x15ca   :  { %v1961_v56 = vpop.f32.mrb[21].mxu0  ;;  %v1026_v61 = vadd.f32 %v2466_v59, %v1010_v55 }
0x15cb   :  { %v1013_v57 = vpop.f32.mrb[22].mxu0 }
0x15cc   :  { %v1962_v58 = vpop.f32.mrb[23].mxu0  ;;  %1028 = vrot.lane.b32.xlu1 %v1026_v61, %s2158_s28 }
0x15ea   :  { %v897_v62 = vpop.permute.xlu1 %896 }
0x15eb   :  { %1952 = vmatmul.mubr.msk.bf16.vlgmr.msra.gmra.mrb[16].mxu1 %vm158_vm4, %v897_v62 }
0x15ec   :  { %1964 = vmatpush3.bf16.msra.mxu1 %v2426_v41  ;;  %1967 = vmatprep.mubr.msk.bf16.mxu1 %vm2156_vm2, %v2154_v0 }
0x15ed   :  { %1965 = vmatprep.subr.bf16.mxu1 %v2154_v0 }
0x15f0   :  { %1966 = vmatpush3.bf16.msra.mxu1 %v2437_v20 }
0x15f1   :  { %1979 = vmatprep.subr.bf16.mxu1 %v2154_v0 }
0x163e   :  { %v1029_v13 = vpop.permute.xlu1 %1028 }
0x16be   :  { %v1953_v43 = vpop.f32.mrb[16].mxu1 }
0x16bf   :  { %v2480_v63 = vadd.f32 %v1953_v43, %v1760_v45  ;;  %v950_v1 = vpop.f32.mrb[17].mxu1 }
0x16c0   :  { %v2482_v5 = vadd.f32 %v1760_v45, %v950_v1  ;;  %v1954_v6 = vpop.f32.mrb[18].mxu1 }
0x16c1   :  { %v953_v28 = vpop.f32.mrb[19].mxu1 }
0x16c2   :  { %v1016_v7 = vadd.f32 %v1010_v55, %v2482_v5  ;;  %v2485_v8 = vadd.f32 %v1760_v45, %v953_v28 }
0x16c4   :  { %v1792_v9 = vmul.f32 -1.442695, %v1016_v7 }
0x16c6   :  { %2094 = vpow2.f32 %v1792_v9 }
0x16d0   :  { %v2095_v10 = vpop.eup %2094 }
0x16d1   :  { %v1020_v11 = vadd.f32 1.0, %v2095_v10 }
0x16d3   :  { %2096 = vrcp.f32 %v1020_v11 }
0x16dd   :  { %v2097_v4 = vpop.eup %2096 }
0x16de   :  { %v1031_v14 = vmul.f32 %v2097_v4, %v1029_v13  ;;  %v1038_v18 = vsub.f32 1.0, %v2097_v4  ;;  %v1044_v21 = vmul.f32 0.0, %v2097_v4 }
0x16e0   :  { %1033 = vrot.lane.b32.xlu0 %v1031_v14, %s2157_s27 }
0x1752   :  { %v1034_v16 = vpop.permute.xlu0 %1033 }
0x1753   :  { %v1036_v17 = vadd.f32 %v1034_v16, %v2482_v5 }
0x1755   :  { %2098 = vtanh.f32 %v1036_v17 }
0x175f   :  { %v2099_v12 = vpop.eup %2098 }
0x1760   :  { %1040 = vrot.lane.b32.xlu1 %v2099_v12, %s2159_s2 }
0x17d2   :  { %v1041_v19 = vpop.permute.xlu1 %1040 }
0x17d3   :  { %v1043_v22 = vmul.f32 %v1041_v19, %v1038_v18 }
0x17d5   :  { %v2490_v23 = vadd.f32 %v1044_v21, %v1043_v22 }
0x17d7   :  { %v1052_v24 = vpack.c.bf16 %v2490_v23, %v2490_v23  ;;  %v1128_v46 = vrot.slane %v2490_v23, 5 }
0x17d9   :  { %1054 = vrot.lane.b32.xlu0 %v1052_v24, %s2159_s2 }
0x184b   :  { %v1055_v25 = vpop.permute.xlu0 %1054 }
0x184c   :  { %1968 = vmatmul.mubr.msk.bf16.vlgmr.msra.gmra.mrb[20].mxu1 %vm158_vm4, %v1055_v25 }
0x184d   :  { %1980 = vmatpush3.bf16.msra.mxu1 %v2426_v41  ;;  %1983 = vmatprep.mubr.msk.bf16.mxu1 %vm2156_vm2, %v2154_v0 }
0x184e   :  { %1981 = vmatprep.subr.bf16.mxu1 %v2154_v0 }
0x1851   :  { %1982 = vmatpush3.bf16.msra.mxu1 %v2437_v20 }
0x1852   :  { %1995 = vmatprep.subr.bf16.mxu1 %v2154_v0 }
0x191f   :  { %v1093_v26 = vpop.f32.mrb[20].mxu1 }
0x1920   :  { %v1109_v29 = vadd.f32 %v1093_v26, %v2466_v59  ;;  %v1969_v30 = vpop.f32.mrb[21].mxu1  ;;  %v1100_v34 = vrot.slane %v1093_v26, 5 }
0x1921   :  { %v1096_v31 = vpop.f32.mrb[22].mxu1 }
0x1922   :  { %v1111_v32 = vrot.slane %v1109_v29, 5  ;;  %v1970_v33 = vpop.f32.mrb[23].mxu1  ;;  %v1102_v35 = vadd.f32 %v1100_v34, %v2482_v5 }
0x1924   :  { %1112 = vrot.lane.b32.xlu1 %v1111_v32, %s2158_s28  ;;  %v1794_v36 = vmul.f32 -1.442695, %v1102_v35 }
0x1926   :  { %2100 = vpow2.f32 %v1794_v36 }
0x1930   :  { %v2101_v37 = vpop.eup %2100 }
0x1931   :  { %v1106_v38 = vadd.f32 1.0, %v2101_v37 }
0x1933   :  { %2102 = vrcp.f32 %v1106_v38 }
0x193d   :  { %v2103_v15 = vpop.eup %2102 }
0x193e   :  { %v1122_v27 = vsub.f32 1.0, %v2103_v15  ;;  %v1130_v2 = vmul.f32 %v2103_v15, %v1128_v46 }
0x1996   :  { %v1113_v39 = vpop.permute.xlu1 %1112 }
0x1997   :  { %v1115_v40 = vmul.f32 %v2103_v15, %v1113_v39 }
0x1999   :  { %1117 = vrot.lane.b32.xlu0 %v1115_v40, %s2157_s27 }
0x1a0b   :  { %v1118_v42 = vpop.permute.xlu0 %1117 }
0x1a0c   :  { %v1120_v60 = vadd.f32 %v1118_v42, %v2482_v5 }
0x1a0e   :  { %2104 = vtanh.f32 %v1120_v60 }
0x1a18   :  { %v2105_v44 = vpop.eup %2104 }
0x1a19   :  { %1124 = vrot.lane.b32.xlu1 %v2105_v44, %s2159_s2 }
0x1a8b   :  { %v1125_v3 = vpop.permute.xlu1 %1124 }
0x1a8c   :  { %v1127_v47 = vmul.f32 %v1125_v3, %v1122_v27 }
0x1a8e   :  { %v2509_v48 = vadd.f32 %v1130_v2, %v1127_v47 }
0x1a90   :  { %v1139_v49 = vpack.c.bf16 %v2509_v48, %v2509_v48  ;;  %v1242_v30 = vrot.slane %v2509_v48, 5 }
0x1a92   :  { %v1141_v50 = vshrl.u32 %v1139_v49, 16  ;;  %v1144_v52 = vshll.u32 %v1139_v49, 16 }
0x1a94   :  { %v1143_v53 = vrot.slane %v1141_v50, 1  ;;  %v1146_v54 = vrot.slane %v1144_v52, 2 }
0x1a96   :  { %v1147_v55 = vor.u32 %v1146_v54, %v1143_v53 }
0x1a98   :  { %1148 = vrot.lane.b32.xlu0 %v1147_v55, %s2159_s2 }
0x1b0a   :  { %v1149_v56 = vpop.permute.xlu0 %1148 }
0x1b0b   :  { %1976 = vmatmul.mubr.msk.bf16.vlgmr.msra.gmra.mrb[24].mxu0 %vm158_vm4, %v1149_v56 }
0x1b0c   :  { %1988 = vmatpush3.bf16.msra.mxu0 %v2426_v41  ;;  %1991 = vmatprep.mubr.msk.bf16.mxu0 %vm2156_vm2, %v2154_v0 }
0x1b0d   :  { %1989 = vmatprep.subr.bf16.mxu0 %v2154_v0 }
0x1b10   :  { %1990 = vmatpush3.bf16.msra.mxu0 %v2437_v20 }
0x1b11   :  { %2003 = vmatprep.subr.bf16.mxu0 %v2154_v0 }
0x1bde   :  { %v1187_v57 = vpop.f32.mrb[24].mxu0 }
0x1bdf   :  { %v1210_v58 = vadd.f32 %v1187_v57, %v2466_v59  ;;  %v1977_v61 = vpop.f32.mrb[25].mxu0  ;;  %v1194_v1 = vrot.slane %v1187_v57, 2 }
0x1be0   :  { %v1190_v62 = vpop.f32.mrb[26].mxu0 }
0x1be1   :  { %v1212_v45 = vrot.slane %v1210_v58, 2  ;;  %v1978_v43 = vpop.f32.mrb[27].mxu0  ;;  %v1196_v6 = vadd.f32 %v1194_v1, %v2482_v5  ;;  %v1197_v28 = vadd.f32 %v1194_v1, %v2485_v8 }
0x1be3   :  { %1213 = vrot.lane.b32.xlu1 %v1212_v45, %s2158_s28  ;;  %v1797_v7 = vmul.f32 -1.442695, %v1196_v6  ;;  %v1798_v9 = vmul.f32 -1.442695, %v1197_v28 }
0x1be5   :  { %2106 = vpow2.f32 %v1797_v7 }
0x1be6   :  { %2108 = vpow2.f32 %v1798_v9 }
0x1bef   :  { %v2107_v10 = vpop.eup %2106 }
0x1bf0   :  { %v2109_v11 = vpop.eup %2108  ;;  %v1204_v13 = vadd.f32 1.0, %v2107_v10 }
0x1bf1   :  { %v1205_v4 = vadd.f32 1.0, %v2109_v11 }
0x1bf2   :  { %2110 = vrcp.f32 %v1204_v13 }
0x1bf3   :  { %2112 = vrcp.f32 %v1205_v4 }
0x1bfc   :  { %v2111_v14 = vpop.eup %2110 }
0x1bfd   :  { %v2113_v16 = vpop.eup %2112  ;;  %v1230_v32 = vsub.f32 1.0, %v2111_v14  ;;  %v1244_v36 = vmul.f32 %v2111_v14, %v1242_v30 }
0x1bfe   :  { %v1231_v29 = vsub.f32 1.0, %v2113_v16  ;;  %v1245_v33 = vmul.f32 %v2113_v16, %v1242_v30 }
0x1c55   :  { %v1214_v17 = vpop.permute.xlu1 %1213 }
0x1c56   :  { %v1216_v12 = vmul.f32 %v2111_v14, %v1214_v17  ;;  %v1217_v18 = vmul.f32 %v2113_v16, %v1214_v17 }
0x1c58   :  { %1222 = vrot.lane.b32.xlu1 %v1217_v18, %s2157_s27  ;;  %1220 = vrot.lane.b32.xlu0 %v1216_v12, %s2157_s27 }
0x1cca   :  { %v1223_v19 = vpop.permute.xlu1 %1222  ;;  %v1221_v21 = vpop.permute.xlu0 %1220 }
0x1ccb   :  { %v1227_v22 = vadd.f32 %v1223_v19, %v2485_v8  ;;  %v1226_v24 = vadd.f32 %v1221_v21, %v2482_v5 }
0x1ccd   :  { %2114 = vtanh.f32 %v1227_v22 }
0x1cce   :  { %2116 = vtanh.f32 %v1226_v24 }
0x1cd7   :  { %v2115_v25 = vpop.eup %2114 }
0x1cd8   :  { %v2117_v26 = vpop.eup %2116  ;;  %1236 = vrot.lane.b32.xlu1 %v2115_v25, %s2159_s2 }
0x1cd9   :  { %1234 = vrot.lane.b32.xlu0 %v2117_v26, %s2159_s2 }
0x1d4a   :  { %v1237_v31 = vpop.permute.xlu1 %1236 }
0x1d4b   :  { %v1241_v34 = vmul.f32 %v1237_v31, %v1231_v29  ;;  %v1235_v35 = vpop.permute.xlu0 %1234 }
0x1d4c   :  { %v1240_v37 = vmul.f32 %v1235_v35, %v1230_v32 }
0x1d4d   :  { %v2532_v38 = vadd.f32 %v1245_v33, %v1241_v34 }
0x1d4e   :  { %v2534_v5 = vadd.f32 %v1244_v36, %v1240_v37 }
0x1d4f   :  { %v1339_v61 = vrot.slane %v2532_v38, 5 }
0x1d50   :  { %v1261_v15 = vpack.c.bf16 %v2532_v38, %v2534_v5  ;;  %v1338_v62 = vrot.slane %v2534_v5, 5 }
0x1d52   :  { %v1263_v39 = vrot.slane %v1261_v15, 3  ;;  %v1340_v43 = vsel %vm508_vm5, %v1338_v62, %v1339_v61 }
0x1d54   :  { %1264 = vrot.lane.b32.xlu0 %v1263_v39, %s2159_s2 }
0x1dc6   :  { %v1265_v40 = vpop.permute.xlu0 %1264 }
0x1dc7   :  { %1984 = vmatmul.mubr.msk.bf16.vlgmr.msra.gmra.mrb[24].mxu1 %vm158_vm4, %v1265_v40 }
0x1dc8   :  { %1996 = vmatpush3.bf16.msra.mxu1 %v2426_v41  ;;  %1999 = vmatprep.mubr.msk.bf16.mxu1 %vm2156_vm2, %v2154_v0 }
0x1dc9   :  { %1997 = vmatprep.subr.bf16.mxu1 %v2154_v0 }
0x1dcc   :  { %1998 = vmatpush3.bf16.msra.mxu1 %v2437_v20 }
0x1dcd   :  { %2011 = vmatprep.subr.bf16.mxu1 %v2154_v0 }
0x1e9a   :  { %v1303_v42 = vpop.f32.mrb[24].mxu1 }
0x1e9b   :  { %v1319_v60 = vadd.f32 %v1303_v42, %v2466_v59  ;;  %v1985_v44 = vpop.f32.mrb[25].mxu1  ;;  %v1310_v2 = vrot.slane %v1303_v42, 7 }
0x1e9c   :  { %v1306_v27 = vpop.f32.mrb[26].mxu1 }
0x1e9d   :  { %v1321_v46 = vrot.slane %v1319_v60, 7  ;;  %v1986_v3 = vpop.f32.mrb[27].mxu1  ;;  %v1312_v47 = vadd.f32 %v1310_v2, %v2485_v8 }
0x1e9f   :  { %1322 = vrot.lane.b32.xlu1 %v1321_v46, %s2158_s28  ;;  %v1802_v49 = vmul.f32 -1.442695, %v1312_v47 }
0x1ea1   :  { %2118 = vpow2.f32 %v1802_v49 }
0x1eab   :  { %v2119_v50 = vpop.eup %2118 }
0x1eac   :  { %v1316_v52 = vadd.f32 1.0, %v2119_v50 }
0x1eae   :  { %2120 = vrcp.f32 %v1316_v52 }
0x1eb8   :  { %v2121_v53 = vpop.eup %2120 }
0x1eb9   :  { %v1332_v45 = vsub.f32 1.0, %v2121_v53  ;;  %v1342_v6 = vmul.f32 %v2121_v53, %v1340_v43 }
0x1f11   :  { %v1323_v54 = vpop.permute.xlu1 %1322 }
0x1f12   :  { %v1325_v55 = vmul.f32 %v2121_v53, %v1323_v54 }
0x1f14   :  { %1327 = vrot.lane.b32.xlu0 %v1325_v55, %s2157_s27 }
0x1f86   :  { %v1328_v56 = vpop.permute.xlu0 %1327 }
0x1f87   :  { %v1330_v57 = vadd.f32 %v1328_v56, %v2485_v8 }
0x1f89   :  { %2122 = vtanh.f32 %v1330_v57 }
0x1f93   :  { %v2123_v58 = vpop.eup %2122 }
0x1f94   :  { %1334 = vrot.lane.b32.xlu1 %v2123_v58, %s2159_s2 }
0x2006   :  { %v1335_v1 = vpop.permute.xlu1 %1334 }
0x2007   :  { %v1337_v28 = vmul.f32 %v1335_v1, %v1332_v45 }
0x2009   :  { %v2555_v7 = vadd.f32 %v1342_v6, %v1337_v28 }
0x200b   :  { %v1351_v9 = vpack.c.bf16 %v2555_v7, %v2555_v7  ;;  %v1433_v37 = vrot.slane %v2555_v7, 5 }
0x200d   :  { %v1355_v10 = vshll.u32 %v1351_v9, 16  ;;  %v1353_v11 = vshrl.u32 %v1351_v9, 16 }
0x200f   :  { %v1357_v13 = vrot.slane %v1355_v10, 1 }
0x2011   :  { %v1358_v4 = vor.u32 %v1357_v13, %v1353_v11 }
0x2013   :  { %1359 = vrot.lane.b32.xlu0 %v1358_v4, %s2159_s2 }
0x2085   :  { %v1360_v14 = vpop.permute.xlu0 %1359 }
0x2086   :  { %1992 = vmatmul.mubr.msk.bf16.vlgmr.msra.gmra.mrb[28].mxu0 %vm158_vm4, %v1360_v14 }
0x2087   :  { %2004 = vmatpush3.bf16.msra.mxu0 %v2426_v41  ;;  %2007 = vmatprep.mubr.msk.bf16.mxu0 %vm2156_vm2, %v2154_v0 }
0x2088   :  { %2005 = vmatprep.subr.bf16.mxu0 %v2154_v0 }
0x208b   :  { %2006 = vmatpush3.bf16.msra.mxu0 %v2437_v20 }
0x2159   :  { %v1398_v16 = vpop.f32.mrb[28].mxu0 }
0x215a   :  { %v1414_v17 = vadd.f32 %v1398_v16, %v2466_v59  ;;  %v1993_v12 = vpop.f32.mrb[29].mxu0  ;;  %v1405_v22 = vrot.slane %v1398_v16, 4 }
0x215b   :  { %v1401_v18 = vpop.f32.mrb[30].mxu0 }
0x215c   :  { %v1416_v19 = vrot.slane %v1414_v17, 4  ;;  %v1994_v21 = vpop.f32.mrb[31].mxu0  ;;  %v1407_v24 = vadd.f32 %v1405_v22, %v2485_v8 }
0x215e   :  { %1417 = vrot.lane.b32.xlu1 %v1416_v19, %s2158_s28  ;;  %v1805_v25 = vmul.f32 -1.442695, %v1407_v24 }
0x2160   :  { %2124 = vpow2.f32 %v1805_v25 }
0x216a   :  { %v2125_v26 = vpop.eup %2124 }
0x216b   :  { %v1411_v29 = vadd.f32 1.0, %v2125_v26 }
0x216d   :  { %2126 = vrcp.f32 %v1411_v29 }
0x2177   :  { %v2127_v30 = vpop.eup %2126 }
0x2178   :  { %v1427_v36 = vsub.f32 1.0, %v2127_v30  ;;  %v1435_v39 = vmul.f32 %v2127_v30, %v1433_v37 }
0x21d0   :  { %v1418_v31 = vpop.permute.xlu1 %1417 }
0x21d1   :  { %v1420_v32 = vmul.f32 %v2127_v30, %v1418_v31 }
0x21d3   :  { %1422 = vrot.lane.b32.xlu0 %v1420_v32, %s2157_s27 }
0x2245   :  { %v1423_v33 = vpop.permute.xlu0 %1422 }
0x2246   :  { %v1425_v34 = vadd.f32 %v1423_v33, %v2485_v8 }
0x2248   :  { %2128 = vtanh.f32 %v1425_v34 }
0x2252   :  { %v2129_v35 = vpop.eup %2128 }
0x2253   :  { %1429 = vrot.lane.b32.xlu1 %v2129_v35, %s2159_s2 }
0x22c5   :  { %v1430_v15 = vpop.permute.xlu1 %1429 }
0x22c6   :  { %v1432_v40 = vmul.f32 %v1430_v15, %v1427_v36 }
0x22c8   :  { %v2573_v42 = vadd.f32 %v1435_v39, %v1432_v40 }
0x22ca   :  { %v1444_v60 = vpack.c.bf16 %v2573_v42, %v2573_v42  ;;  %v1541_v4 = vrot.slane %v2573_v42, 5 }
0x22cc   :  { %v1446_v44 = vrot.slane %v1444_v60, 2 }
0x22ce   :  { %1447 = vrot.lane.b32.xlu0 %v1446_v44, %s2159_s2 }
0x2340   :  { %v1448_v27 = vpop.permute.xlu0 %1447 }
0x2341   :  { %2000 = vmatmul.mubr.msk.bf16.vlgmr.msra.gmra.mrb[28].mxu1 %vm158_vm4, %v1448_v27 }
0x2342   :  { %2012 = vmatpush3.bf16.msra.mxu1 %v2426_v41  ;;  %2015 = vmatprep.mubr.msk.bf16.mxu1 %vm2156_vm2, %v2154_v0  ;;  %vm1442_vm2 = vcmask 137220  }
0x2343   :  { %2013 = vmatprep.subr.bf16.mxu1 %v2154_v0 }
0x2346   :  { %2014 = vmatpush3.bf16.msra.mxu1 %v2437_v20 }
0x2414   :  { %v1486_v46 = vpop.f32.mrb[28].mxu1 }
0x2415   :  { %v1509_v3 = vadd.f32 %v1486_v46, %v2466_v59  ;;  %v2001_v2 = vpop.f32.mrb[29].mxu1  ;;  %v1493_v52 = vrot.slane %v1486_v46, 1 }
0x2416   :  { %v1489_v47 = vpop.f32.mrb[30].mxu1 }
0x2417   :  { %v1511_v49 = vrot.slane %v1509_v3, 1  ;;  %v2002_v50 = vpop.f32.mrb[31].mxu1  ;;  %v1495_v53 = vadd.f32 %v1493_v52, %v2485_v8  ;;  %v1496_v41 = vadd.f32 %v1493_v52, %v2480_v63 }
0x2419   :  { %1512 = vrot.lane.b32.xlu1 %v1511_v49, %s2158_s28  ;;  %v1808_v54 = vmul.f32 -1.442695, %v1495_v53  ;;  %v1809_v55 = vmul.f32 -1.442695, %v1496_v41 }
0x241b   :  { %2130 = vpow2.f32 %v1808_v54 }
0x241c   :  { %2132 = vpow2.f32 %v1809_v55 }
0x2425   :  { %v2131_v0 = vpop.eup %2130 }
0x2426   :  { %v2133_v20 = vpop.eup %2132  ;;  %v1503_v56 = vadd.f32 1.0, %v2131_v0 }
0x2427   :  { %v1504_v57 = vadd.f32 1.0, %v2133_v20 }
0x2428   :  { %2134 = vrcp.f32 %v1503_v56 }
0x2429   :  { %2136 = vrcp.f32 %v1504_v57 }
0x2432   :  { %v2135_v58 = vpop.eup %2134 }
0x2433   :  { %v2137_v61 = vpop.eup %2136  ;;  %v1529_v16 = vsub.f32 1.0, %v2135_v58  ;;  %v1543_v19 = vmul.f32 %v2135_v58, %v1541_v4 }
0x2434   :  { %v1530_v13 = vsub.f32 1.0, %v2137_v61  ;;  %v1544_v17 = vmul.f32 %v2137_v61, %v1541_v4 }
0x248b   :  { %v1513_v62 = vpop.permute.xlu1 %1512 }
0x248c   :  { %v1515_v45 = vmul.f32 %v2135_v58, %v1513_v62  ;;  %v1516_v43 = vmul.f32 %v2137_v61, %v1513_v62 }
0x248e   :  { %1521 = vrot.lane.b32.xlu1 %v1516_v43, %s2157_s27  ;;  %1519 = vrot.lane.b32.xlu0 %v1515_v45, %s2157_s27 }
0x2500   :  { %v1522_v1 = vpop.permute.xlu1 %1521  ;;  %v1520_v6 = vpop.permute.xlu0 %1519 }
0x2501   :  { %v1526_v28 = vadd.f32 %v1522_v1, %v2480_v63  ;;  %v1525_v9 = vadd.f32 %v1520_v6, %v2485_v8 }
0x2503   :  { %2138 = vtanh.f32 %v1526_v28 }
0x2504   :  { %2140 = vtanh.f32 %v1525_v9 }
0x250d   :  { %v2139_v10 = vpop.eup %2138 }
0x250e   :  { %v2141_v11 = vpop.eup %2140  ;;  %1535 = vrot.lane.b32.xlu1 %v2139_v10, %s2159_s2 }
0x250f   :  { %1533 = vrot.lane.b32.xlu0 %v2141_v11, %s2159_s2 }
0x2580   :  { %v1536_v14 = vpop.permute.xlu1 %1535 }
0x2581   :  { %v1540_v12 = vmul.f32 %v1536_v14, %v1530_v13  ;;  %v1534_v18 = vpop.permute.xlu0 %1533 }
0x2582   :  { %v1539_v21 = vmul.f32 %v1534_v18, %v1529_v16 }
0x2583   :  { %v2595_v22 = vadd.f32 %v1544_v17, %v1540_v12 }
0x2584   :  { %v2597_v8 = vadd.f32 %v1543_v19, %v1539_v21 }
0x2585   :  { %v1644_v52 = vrot.slane %v2595_v22, 5 }
0x2586   :  { %v1560_v24 = vpack.c.bf16 %v2595_v22, %v2597_v8  ;;  %v1643_v53 = vrot.slane %v2597_v8, 5 }
0x2588   :  { %v1562_v25 = vshrl.u32 %v1560_v24, 16  ;;  %v1565_v26 = vshll.u32 %v1560_v24, 16  ;;  %v1645_v54 = vsel %vm508_vm5, %v1643_v53, %v1644_v52 }
0x258a   :  { %v1564_v29 = vrot.slane %v1562_v25, 3  ;;  %v1567_v30 = vrot.slane %v1565_v26, 4 }
0x258c   :  { %v1568_v31 = vor.u32 %v1567_v30, %v1564_v29 }
0x258e   :  { %1569 = vrot.lane.b32.xlu0 %v1568_v31, %s2159_s2 }
0x2600   :  { %v1570_v32 = vpop.permute.xlu0 %1569 }
0x2601   :  { %2008 = vmatmul.mubr.msk.bf16.vlgmr.msra.gmra.mrb[32].mxu0 %vm158_vm4, %v1570_v32 }
0x26d4   :  { %v1608_v33 = vpop.f32.mrb[32].mxu0 }
0x26d5   :  { %v1624_v34 = vadd.f32 %v1608_v33, %v2466_v59  ;;  %v2009_v35 = vpop.f32.mrb[33].mxu0  ;;  %v1615_v39 = vrot.slane %v1608_v33, 6 }
0x26d6   :  { %v1611_v36 = vpop.f32.mrb[34].mxu0 }
0x26d7   :  { %v1626_v37 = vrot.slane %v1624_v34, 6  ;;  %v2010_v15 = vpop.f32.mrb[35].mxu0  ;;  %v1617_v40 = vadd.f32 %v1615_v39, %v2480_v63 }
0x26d9   :  { %1627 = vrot.lane.b32.xlu1 %v1626_v37, %s2158_s28  ;;  %v1813_v60 = vmul.f32 -1.442695, %v1617_v40 }
0x26db   :  { %2142 = vpow2.f32 %v1813_v60 }
0x26e5   :  { %v2143_v44 = vpop.eup %2142 }
0x26e6   :  { %v1621_v27 = vadd.f32 1.0, %v2143_v44 }
0x26e8   :  { %2144 = vrcp.f32 %v1621_v27 }
0x26f2   :  { %v2145_v46 = vpop.eup %2144 }
0x26f3   :  { %v1637_v41 = vsub.f32 1.0, %v2145_v46  ;;  %v1647_v0 = vmul.f32 %v2145_v46, %v1645_v54 }
0x274b   :  { %v1628_v3 = vpop.permute.xlu1 %1627 }
0x274c   :  { %v1630_v2 = vmul.f32 %v2145_v46, %v1628_v3 }
0x274e   :  { %1632 = vrot.lane.b32.xlu0 %v1630_v2, %s2157_s27 }
0x27c0   :  { %v1633_v47 = vpop.permute.xlu0 %1632 }
0x27c1   :  { %v1635_v49 = vadd.f32 %v1633_v47, %v2480_v63 }
0x27c3   :  { %2146 = vtanh.f32 %v1635_v49 }
0x27cd   :  { %v2147_v50 = vpop.eup %2146 }
0x27ce   :  { %1639 = vrot.lane.b32.xlu1 %v2147_v50, %s2159_s2 }
0x2840   :  { %v1640_v55 = vpop.permute.xlu1 %1639 }
0x2841   :  { %v1642_v20 = vmul.f32 %v1640_v55, %v1637_v41 }
0x2843   :  { %v2612_v56 = vadd.f32 %v1647_v0, %v1642_v20 }
0x2845   :  { %v1656_v57 = vpack.c.bf16 %v2612_v56, %v2612_v56  ;;  %v1733_v21 = vrot.slane %v2612_v56, 5 }
0x2847   :  { %v1658_v58 = vrot.slane %v1656_v57, 1 }
0x2849   :  { %1659 = vrot.lane.b32.xlu0 %v1658_v58, %s2159_s2 }
0x28bb   :  { %v1660_v61 = vpop.permute.xlu0 %1659 }
0x28bc   :  { %2016 = vmatmul.mubr.msk.bf16.vlgmr.msra.gmra.mrb[32].mxu1 %vm158_vm4, %v1660_v61 }
0x298f   :  { %v1698_v62 = vpop.f32.mrb[32].mxu1 }
0x2990   :  { %v1714_v45 = vadd.f32 %v1698_v62, %v2466_v59  ;;  %v2017_v43 = vpop.f32.mrb[33].mxu1  ;;  %v1705_v9 = vrot.slane %v1698_v62, 3 }
0x2991   :  { %v1701_v1 = vpop.f32.mrb[34].mxu1 }
0x2992   :  { %v1716_v6 = vrot.slane %v1714_v45, 3  ;;  %v2018_v28 = vpop.f32.mrb[35].mxu1  ;;  %v1707_v10 = vadd.f32 %v1705_v9, %v2480_v63 }
0x2994   :  { %1717 = vrot.lane.b32.xlu1 %v1716_v6, %s2158_s28  ;;  %v1816_v11 = vmul.f32 -1.442695, %v1707_v10 }
0x2996   :  { %2148 = vpow2.f32 %v1816_v11 }
0x29a0   :  { %v2149_v13 = vpop.eup %2148 }
0x29a1   :  { %v1711_v4 = vadd.f32 1.0, %v2149_v13 }
0x29a3   :  { %2150 = vrcp.f32 %v1711_v4 }
0x29ad   :  { %v2151_v14 = vpop.eup %2150 }
0x29ae   :  { %v1735_v24 = vmul.f32 %v2151_v14, %v1733_v21 }
0x2a06   :  { %v1718_v16 = vpop.permute.xlu1 %1717 }
0x2a07   :  { %v1720_v17 = vmul.f32 %v2151_v14, %v1718_v16 }
0x2a09   :  { %1722 = vrot.lane.b32.xlu0 %v1720_v17, %s2157_s27 }
0x2a0d   :  { %1047 = vrot.lane.b32.xlu0 %v2490_v23, %s2159_s2 }
0x2a11   :  { %1250 = vrot.lane.b32.xlu0 %v2534_v5, %s2159_s2 }
0x2a15   :  { %1345 = vrot.lane.b32.xlu0 %v2555_v7, %s2159_s2 }
0x2a19   :  { %1549 = vrot.lane.b32.xlu0 %v2597_v8, %s2159_s2 }
0x2a1d   :  { %1650 = vrot.lane.b32.xlu0 %v2612_v56, %s2159_s2 }
0x2a21   :  { %1745 = vrot.lane.b32.xlu0 %v2459_v51, %s2159_s2 }
0x2a7b   :  { %v1723_v59 = vpop.permute.xlu0 %1722 }
0x2a7c   :  { %v1725_v12 = vadd.f32 %v1723_v59, %v2480_v63 }
0x2a7e   :  { %2152 = vtanh.f32 %v1725_v12 }
0x2a7f   :  { %v1048_v23 = vpop.permute.xlu0 %1047 }
0x2a80   :  { %1051 = vst.msk [vmem:[%s2694_s9] sm:$0x7] %vm1050_vm10, %v1048_v23 }
0x2a83   :  { %v1251_v5 = vpop.permute.xlu0 %1250 }
0x2a84   :  { %1799 = vst.msk [vmem:[%s2694_s9 + $0x2] sm:$0xc0] %vm1257_vm11, %v1251_v5 }
0x2a87   :  { %v1346_v7 = vpop.permute.xlu0 %1345 }
0x2a88   :  { %v2153_v18 = vpop.eup %2152  ;;  %1803 = vst.msk [vmem:[%s2694_s9 + $0xb] sm:$0xe] %vm1349_vm12, %v1346_v7 }
0x2a89   :  { %1729 = vrot.lane.b32.xlu1 %v2153_v18, %s2159_s2 }
0x2a8b   :  { %v1550_v51 = vpop.permute.xlu0 %1549 }
0x2a8c   :  { %1810 = vst.msk [vmem:[%s2694_s9 + $0xd] sm:$0x80] %vm1556_vm13, %v1550_v51 }
0x2a8d   :  { %1133 = vrot.lane.b32.xlu1 %v2509_v48, %s2159_s2  ;;  %v1727_v48 = vsub.f32 1.0, %v2151_v14 }
0x2a8f   :  { %v1651_v63 = vpop.permute.xlu0 %1650 }
0x2a90   :  { %1814 = vst.msk [vmem:[%s2694_s9 + $0x16] sm:$0x1c] %vm1654_vm14, %v1651_v63 }
0x2a91   :  { %1252 = vrot.lane.b32.xlu1 %v2532_v38, %s2159_s2 }
0x2a93   :  { %v1746_v19 = vpop.permute.xlu0 %1745 }
0x2a94   :  { %1748 = vst.msk [vmem:[%s2695_s10 - $0x5] sm:$0xe0] %vm1742_vm15, %v1746_v19 }
0x2a95   :  { %1438 = vrot.lane.b32.xlu1 %v2573_v42, %s2159_s2 }
0x2a99   :  { %1551 = vrot.lane.b32.xlu1 %v2595_v22, %s2159_s2 }
0x2afb   :  { %v1730_v8 = vpop.permute.xlu1 %1729 }
0x2afc   :  { %v1732_v25 = vmul.f32 %v1730_v8, %v1727_v48 }
0x2afe   :  { %v1736_v38 = vadd.f32 %v1735_v24, %v1732_v25 }
0x2aff   :  { %v1134_v26 = vpop.permute.xlu1 %1133 }
0x2b00   :  { %1795 = vst.msk [vmem:[%s2694_s9 + $0x1] sm:$0x38] %vm1137_vm0, %v1134_v26  ;;  %1738 = vrot.lane.b32.xlu1 %v1736_v38, %s2159_s2 }
0x2b03   :  { %v1253_v42 = vpop.permute.xlu1 %1252 }
0x2b04   :  { %1800 = vst.msk [vmem:[%s2694_s9 + $0xa] sm:$0x1] %vm1259_vm1, %v1253_v42 }
0x2b07   :  { %v1439_v22 = vpop.permute.xlu1 %1438 }
0x2b08   :  { %1806 = vst.msk [vmem:[%s2694_s9 + $0xc] sm:$0x70] %vm1442_vm2, %v1439_v22 }
0x2b0b   :  { %v1552_v29 = vpop.permute.xlu1 %1551 }
0x2b0c   :  { %1811 = vst.msk [vmem:[%s2694_s9 + $0x15] sm:$0x3] %vm1558_vm3, %v1552_v29 }
0x2b72   :  { %v1739_v30 = vpop.permute.xlu1 %1738 }
0x2b73   :  { %1817 = vst.msk [vmem:[%s2694_s9 + $0x17] sm:$0xe0] %vm1742_vm15, %v1739_v30  ;;  %1818 = vst.msk [vmem:[%s2695_s10 - $0x1] sm:$0xe0] %vm1742_vm15, %v1739_v30 }

</bundles_post_ra>
